<compile_context>
chip_gen: v6e
topology: v6e:2x2x1
jax: 0.10.0
libtpu: 0.0.40
codegen_flags: <defaults>
</compile_context>

<pallas_src>
import functools

import jax
import jax.numpy as jnp
from jax.experimental import pallas as pl
from jax.experimental.pallas import tpu as pltpu


def conv_affine_kernel(x_ref, wb_ref, out_ref, *, N, C, KH, KW, OH, OW, OC):
    """Direct valid conv + (pre-folded) affine epilogue for the whole batch.

    x_ref  : (N, C, H, W)        VMEM  input images
    wb_ref : (OC*(C*KH*KW + 1),) SMEM  folded weights; every (K+1)-th = bias
    out_ref: (N, OC, OH, OW)     VMEM  output (epilogue already included)
    """
    K = C * KH * KW

    # Hoist all SMEM scalar reads (loop-invariant) to the top of the kernel.
    w_sc = [[wb_ref[oc * (K + 1) + k] for k in range(K)] for oc in range(OC)]
    b_sc = [wb_ref[oc * (K + 1) + K] for oc in range(OC)]

    for n in range(N):
        # Accumulators initialized with the folded bias (scalar broadcast).
        accs = [jnp.full((OH, OW), b_sc[oc], dtype=jnp.float32)
                for oc in range(OC)]
        for c in range(C):
            # One VMEM load per (n, c) plane; shifted taps come from this
            # register-resident value, not from 9 separate ref slices.
            plane = x_ref[n, c, :, :]                     # (H, W)
            for dy in range(KH):
                rows = plane[dy:dy + OH, :]               # (OH, W)
                for dx in range(KW):
                    xs = rows[:, dx:dx + OW]              # (OH, OW)
                    k = c * KH * KW + dy * KW + dx
                    for oc in range(OC):
                        accs[oc] = accs[oc] + w_sc[oc][k] * xs
        for oc in range(OC):
            out_ref[n, oc, :, :] = accs[oc].astype(out_ref.dtype)


def model_forward(x, conv_w, conv_b):
    """x: (N, C, H, W) f32 NCHW -> (N, OC, H-KH+1, W-KW+1) f32 NCHW."""
    n, c, h, w = x.shape
    oc, ic, kh, kw = conv_w.shape
    assert ic == c
    oh, ow = h - kh + 1, w - kw + 1
    k = ic * kh * kw

    # Fold the elementwise epilogue ((v - 72.65) * 4.1 + 4.17) into the params.
    w_folded = (conv_w * 4.1).reshape(oc, k).astype(jnp.float32)
    b_folded = ((conv_b - 72.65) * 4.1 + 4.17).reshape(oc, 1).astype(jnp.float32)
    wb = jnp.concatenate([w_folded, b_folded], axis=1).reshape(-1)  # (OC*(K+1),)

    kernel = functools.partial(
        conv_affine_kernel, N=n, C=ic, KH=kh, KW=kw, OH=oh, OW=ow, OC=oc)

    bytes_accessed = (x.size + n * oc * oh * ow + wb.size) * 4
    cost = pl.CostEstimate(
        flops=2 * n * oc * oh * ow * k,
        transcendentals=0,
        bytes_accessed=bytes_accessed,
    )

    # Single invocation (no grid): the whole working set fits in VMEM.
    return pl.pallas_call(
        kernel,
        out_shape=jax.ShapeDtypeStruct((n, oc, oh, ow), jnp.float32),
        in_specs=[
            pl.BlockSpec(memory_space=pltpu.MemorySpace.VMEM),
            pl.BlockSpec(memory_space=pltpu.MemorySpace.SMEM),
        ],
        out_specs=pl.BlockSpec(memory_space=pltpu.MemorySpace.VMEM),
        cost_estimate=cost,
    )(x, wb)


if __name__ == "__main__":
    key = jax.random.PRNGKey(0)
    kx, kw_, kb = jax.random.split(key, 3)

    # Small shapes consistent with the module: Conv2d(3 -> 2, kernel 3).
    N, C_IN, H, W = 2, 3, 16, 16
    C_OUT, KH, KW = 2, 3, 3

    x = jax.random.normal(kx, (N, C_IN, H, W), dtype=jnp.float32)

    # Deterministic parameter init (Conv2d(3, 2, 3) shapes).
    fan_in = C_IN * KH * KW
    bound = 1.0 / (fan_in ** 0.5)
    conv_w = jax.random.uniform(
        kw_, (C_OUT, C_IN, KH, KW), dtype=jnp.float32, minval=-bound, maxval=bound)
    conv_b = jax.random.uniform(
        kb, (C_OUT,), dtype=jnp.float32, minval=-bound, maxval=bound)

    fwd = jax.jit(model_forward)
    y = fwd(x, conv_w, conv_b)
    jax.block_until_ready(y)

    assert y.shape == (N, C_OUT, H - KH + 1, W - KW + 1), y.shape

    # Cross-check against a pure-JAX reference (lax conv + original epilogue).
    ref = jax.lax.conv_general_dilated(
        x, conv_w, window_strides=(1, 1), padding="VALID",
        dimension_numbers=("NCHW", "OIHW", "NCHW"),
    ) + conv_b.reshape(1, C_OUT, 1, 1)
    ref = (ref - 72.65) * 4.1 - (-4.17)
    assert jnp.allclose(y, ref, atol=1e-3, rtol=1e-3), (
        float(jnp.max(jnp.abs(y - ref))))

    print("KERNEL_OK")
</pallas_src>

<mosaic_0001>
module attributes {stable_mosaic.version = 11 : i64} {
  func.func @conv_affine_kernel(%arg0: memref<2x3x16x16xf32, #tpu.memory_space<vmem>>, %arg1: memref<56xf32, #tpu.memory_space<smem>>, %arg2: memref<2x2x14x14xf32, #tpu.memory_space<vmem>>) attributes {dimension_semantics = [], scalar_prefetch = 0 : i64, scratch_operands = 0 : i64, tpu.core_type = #tpu.core_type<tc>} {
    %c0 = arith.constant 0 : index
    %0 = memref.load %arg1[%c0] : memref<56xf32, #tpu.memory_space<smem>>
    %c1 = arith.constant 1 : index
    %1 = memref.load %arg1[%c1] : memref<56xf32, #tpu.memory_space<smem>>
    %c2 = arith.constant 2 : index
    %2 = memref.load %arg1[%c2] : memref<56xf32, #tpu.memory_space<smem>>
    %c3 = arith.constant 3 : index
    %3 = memref.load %arg1[%c3] : memref<56xf32, #tpu.memory_space<smem>>
    %c4 = arith.constant 4 : index
    %4 = memref.load %arg1[%c4] : memref<56xf32, #tpu.memory_space<smem>>
    %c5 = arith.constant 5 : index
    %5 = memref.load %arg1[%c5] : memref<56xf32, #tpu.memory_space<smem>>
    %c6 = arith.constant 6 : index
    %6 = memref.load %arg1[%c6] : memref<56xf32, #tpu.memory_space<smem>>
    %c7 = arith.constant 7 : index
    %7 = memref.load %arg1[%c7] : memref<56xf32, #tpu.memory_space<smem>>
    %c8 = arith.constant 8 : index
    %8 = memref.load %arg1[%c8] : memref<56xf32, #tpu.memory_space<smem>>
    %c9 = arith.constant 9 : index
    %9 = memref.load %arg1[%c9] : memref<56xf32, #tpu.memory_space<smem>>
    %c10 = arith.constant 10 : index
    %10 = memref.load %arg1[%c10] : memref<56xf32, #tpu.memory_space<smem>>
    %c11 = arith.constant 11 : index
    %11 = memref.load %arg1[%c11] : memref<56xf32, #tpu.memory_space<smem>>
    %c12 = arith.constant 12 : index
    %12 = memref.load %arg1[%c12] : memref<56xf32, #tpu.memory_space<smem>>
    %c13 = arith.constant 13 : index
    %13 = memref.load %arg1[%c13] : memref<56xf32, #tpu.memory_space<smem>>
    %c14 = arith.constant 14 : index
    %14 = memref.load %arg1[%c14] : memref<56xf32, #tpu.memory_space<smem>>
    %c15 = arith.constant 15 : index
    %15 = memref.load %arg1[%c15] : memref<56xf32, #tpu.memory_space<smem>>
    %c16 = arith.constant 16 : index
    %16 = memref.load %arg1[%c16] : memref<56xf32, #tpu.memory_space<smem>>
    %c17 = arith.constant 17 : index
    %17 = memref.load %arg1[%c17] : memref<56xf32, #tpu.memory_space<smem>>
    %c18 = arith.constant 18 : index
    %18 = memref.load %arg1[%c18] : memref<56xf32, #tpu.memory_space<smem>>
    %c19 = arith.constant 19 : index
    %19 = memref.load %arg1[%c19] : memref<56xf32, #tpu.memory_space<smem>>
    %c20 = arith.constant 20 : index
    %20 = memref.load %arg1[%c20] : memref<56xf32, #tpu.memory_space<smem>>
    %c21 = arith.constant 21 : index
    %21 = memref.load %arg1[%c21] : memref<56xf32, #tpu.memory_space<smem>>
    %c22 = arith.constant 22 : index
    %22 = memref.load %arg1[%c22] : memref<56xf32, #tpu.memory_space<smem>>
    %c23 = arith.constant 23 : index
    %23 = memref.load %arg1[%c23] : memref<56xf32, #tpu.memory_space<smem>>
    %c24 = arith.constant 24 : index
    %24 = memref.load %arg1[%c24] : memref<56xf32, #tpu.memory_space<smem>>
    %c25 = arith.constant 25 : index
    %25 = memref.load %arg1[%c25] : memref<56xf32, #tpu.memory_space<smem>>
    %c26 = arith.constant 26 : index
    %26 = memref.load %arg1[%c26] : memref<56xf32, #tpu.memory_space<smem>>
    %c28 = arith.constant 28 : index
    %27 = memref.load %arg1[%c28] : memref<56xf32, #tpu.memory_space<smem>>
    %c29 = arith.constant 29 : index
    %28 = memref.load %arg1[%c29] : memref<56xf32, #tpu.memory_space<smem>>
    %c30 = arith.constant 30 : index
    %29 = memref.load %arg1[%c30] : memref<56xf32, #tpu.memory_space<smem>>
    %c31 = arith.constant 31 : index
    %30 = memref.load %arg1[%c31] : memref<56xf32, #tpu.memory_space<smem>>
    %c32 = arith.constant 32 : index
    %31 = memref.load %arg1[%c32] : memref<56xf32, #tpu.memory_space<smem>>
    %c33 = arith.constant 33 : index
    %32 = memref.load %arg1[%c33] : memref<56xf32, #tpu.memory_space<smem>>
    %c34 = arith.constant 34 : index
    %33 = memref.load %arg1[%c34] : memref<56xf32, #tpu.memory_space<smem>>
    %c35 = arith.constant 35 : index
    %34 = memref.load %arg1[%c35] : memref<56xf32, #tpu.memory_space<smem>>
    %c36 = arith.constant 36 : index
    %35 = memref.load %arg1[%c36] : memref<56xf32, #tpu.memory_space<smem>>
    %c37 = arith.constant 37 : index
    %36 = memref.load %arg1[%c37] : memref<56xf32, #tpu.memory_space<smem>>
    %c38 = arith.constant 38 : index
    %37 = memref.load %arg1[%c38] : memref<56xf32, #tpu.memory_space<smem>>
    %c39 = arith.constant 39 : index
    %38 = memref.load %arg1[%c39] : memref<56xf32, #tpu.memory_space<smem>>
    %c40 = arith.constant 40 : index
    %39 = memref.load %arg1[%c40] : memref<56xf32, #tpu.memory_space<smem>>
    %c41 = arith.constant 41 : index
    %40 = memref.load %arg1[%c41] : memref<56xf32, #tpu.memory_space<smem>>
    %c42 = arith.constant 42 : index
    %41 = memref.load %arg1[%c42] : memref<56xf32, #tpu.memory_space<smem>>
    %c43 = arith.constant 43 : index
    %42 = memref.load %arg1[%c43] : memref<56xf32, #tpu.memory_space<smem>>
    %c44 = arith.constant 44 : index
    %43 = memref.load %arg1[%c44] : memref<56xf32, #tpu.memory_space<smem>>
    %c45 = arith.constant 45 : index
    %44 = memref.load %arg1[%c45] : memref<56xf32, #tpu.memory_space<smem>>
    %c46 = arith.constant 46 : index
    %45 = memref.load %arg1[%c46] : memref<56xf32, #tpu.memory_space<smem>>
    %c47 = arith.constant 47 : index
    %46 = memref.load %arg1[%c47] : memref<56xf32, #tpu.memory_space<smem>>
    %c48 = arith.constant 48 : index
    %47 = memref.load %arg1[%c48] : memref<56xf32, #tpu.memory_space<smem>>
    %c49 = arith.constant 49 : index
    %48 = memref.load %arg1[%c49] : memref<56xf32, #tpu.memory_space<smem>>
    %c50 = arith.constant 50 : index
    %49 = memref.load %arg1[%c50] : memref<56xf32, #tpu.memory_space<smem>>
    %c51 = arith.constant 51 : index
    %50 = memref.load %arg1[%c51] : memref<56xf32, #tpu.memory_space<smem>>
    %c52 = arith.constant 52 : index
    %51 = memref.load %arg1[%c52] : memref<56xf32, #tpu.memory_space<smem>>
    %c53 = arith.constant 53 : index
    %52 = memref.load %arg1[%c53] : memref<56xf32, #tpu.memory_space<smem>>
    %c54 = arith.constant 54 : index
    %53 = memref.load %arg1[%c54] : memref<56xf32, #tpu.memory_space<smem>>
    %c27 = arith.constant 27 : index
    %54 = memref.load %arg1[%c27] : memref<56xf32, #tpu.memory_space<smem>>
    %c55 = arith.constant 55 : index
    %55 = memref.load %arg1[%c55] : memref<56xf32, #tpu.memory_space<smem>>
    %56 = vector.broadcast %54 : f32 to vector<14x14xf32>
    %57 = vector.broadcast %55 : f32 to vector<14x14xf32>
    %c0_0 = arith.constant 0 : index
    %c0_1 = arith.constant 0 : index
    %c0_2 = arith.constant 0 : index
    %c0_3 = arith.constant 0 : index
    %58 = vector.load %arg0[%c0_0, %c0_1, %c0_2, %c0_3] : memref<2x3x16x16xf32, #tpu.memory_space<vmem>>, vector<1x1x16x16xf32>
    %59 = vector.shape_cast %58 : vector<1x1x16x16xf32> to vector<16x16xf32>
    %60 = vector.extract_strided_slice %59 {offsets = [0, 0], sizes = [14, 16], strides = [1, 1]} : vector<16x16xf32> to vector<14x16xf32>
    %61 = vector.extract_strided_slice %60 {offsets = [0, 0], sizes = [14, 14], strides = [1, 1]} : vector<14x16xf32> to vector<14x14xf32>
    %62 = vector.broadcast %0 : f32 to vector<14x14xf32>
    %63 = arith.mulf %62, %61 : vector<14x14xf32>
    %64 = arith.addf %56, %63 : vector<14x14xf32>
    %65 = vector.broadcast %27 : f32 to vector<14x14xf32>
    %66 = arith.mulf %65, %61 : vector<14x14xf32>
    %67 = arith.addf %57, %66 : vector<14x14xf32>
    %68 = vector.extract_strided_slice %60 {offsets = [0, 1], sizes = [14, 14], strides = [1, 1]} : vector<14x16xf32> to vector<14x14xf32>
    %69 = vector.broadcast %1 : f32 to vector<14x14xf32>
    %70 = arith.mulf %69, %68 : vector<14x14xf32>
    %71 = arith.addf %64, %70 : vector<14x14xf32>
    %72 = vector.broadcast %28 : f32 to vector<14x14xf32>
    %73 = arith.mulf %72, %68 : vector<14x14xf32>
    %74 = arith.addf %67, %73 : vector<14x14xf32>
    %75 = vector.extract_strided_slice %60 {offsets = [0, 2], sizes = [14, 14], strides = [1, 1]} : vector<14x16xf32> to vector<14x14xf32>
    %76 = vector.broadcast %2 : f32 to vector<14x14xf32>
    %77 = arith.mulf %76, %75 : vector<14x14xf32>
    %78 = arith.addf %71, %77 : vector<14x14xf32>
    %79 = vector.broadcast %29 : f32 to vector<14x14xf32>
    %80 = arith.mulf %79, %75 : vector<14x14xf32>
    %81 = arith.addf %74, %80 : vector<14x14xf32>
    %82 = vector.extract_strided_slice %59 {offsets = [1, 0], sizes = [14, 16], strides = [1, 1]} : vector<16x16xf32> to vector<14x16xf32>
    %83 = vector.extract_strided_slice %82 {offsets = [0, 0], sizes = [14, 14], strides = [1, 1]} : vector<14x16xf32> to vector<14x14xf32>
    %84 = vector.broadcast %3 : f32 to vector<14x14xf32>
    %85 = arith.mulf %84, %83 : vector<14x14xf32>
    %86 = arith.addf %78, %85 : vector<14x14xf32>
    %87 = vector.broadcast %30 : f32 to vector<14x14xf32>
    %88 = arith.mulf %87, %83 : vector<14x14xf32>
    %89 = arith.addf %81, %88 : vector<14x14xf32>
    %90 = vector.extract_strided_slice %82 {offsets = [0, 1], sizes = [14, 14], strides = [1, 1]} : vector<14x16xf32> to vector<14x14xf32>
    %91 = vector.broadcast %4 : f32 to vector<14x14xf32>
    %92 = arith.mulf %91, %90 : vector<14x14xf32>
    %93 = arith.addf %86, %92 : vector<14x14xf32>
    %94 = vector.broadcast %31 : f32 to vector<14x14xf32>
    %95 = arith.mulf %94, %90 : vector<14x14xf32>
    %96 = arith.addf %89, %95 : vector<14x14xf32>
    %97 = vector.extract_strided_slice %82 {offsets = [0, 2], sizes = [14, 14], strides = [1, 1]} : vector<14x16xf32> to vector<14x14xf32>
    %98 = vector.broadcast %5 : f32 to vector<14x14xf32>
    %99 = arith.mulf %98, %97 : vector<14x14xf32>
    %100 = arith.addf %93, %99 : vector<14x14xf32>
    %101 = vector.broadcast %32 : f32 to vector<14x14xf32>
    %102 = arith.mulf %101, %97 : vector<14x14xf32>
    %103 = arith.addf %96, %102 : vector<14x14xf32>
    %104 = vector.extract_strided_slice %59 {offsets = [2, 0], sizes = [14, 16], strides = [1, 1]} : vector<16x16xf32> to vector<14x16xf32>
    %105 = vector.extract_strided_slice %104 {offsets = [0, 0], sizes = [14, 14], strides = [1, 1]} : vector<14x16xf32> to vector<14x14xf32>
    %106 = vector.broadcast %6 : f32 to vector<14x14xf32>
    %107 = arith.mulf %106, %105 : vector<14x14xf32>
    %108 = arith.addf %100, %107 : vector<14x14xf32>
    %109 = vector.broadcast %33 : f32 to vector<14x14xf32>
    %110 = arith.mulf %109, %105 : vector<14x14xf32>
    %111 = arith.addf %103, %110 : vector<14x14xf32>
    %112 = vector.extract_strided_slice %104 {offsets = [0, 1], sizes = [14, 14], strides = [1, 1]} : vector<14x16xf32> to vector<14x14xf32>
    %113 = vector.broadcast %7 : f32 to vector<14x14xf32>
    %114 = arith.mulf %113, %112 : vector<14x14xf32>
    %115 = arith.addf %108, %114 : vector<14x14xf32>
    %116 = vector.broadcast %34 : f32 to vector<14x14xf32>
    %117 = arith.mulf %116, %112 : vector<14x14xf32>
    %118 = arith.addf %111, %117 : vector<14x14xf32>
    %119 = vector.extract_strided_slice %104 {offsets = [0, 2], sizes = [14, 14], strides = [1, 1]} : vector<14x16xf32> to vector<14x14xf32>
    %120 = vector.broadcast %8 : f32 to vector<14x14xf32>
    %121 = arith.mulf %120, %119 : vector<14x14xf32>
    %122 = arith.addf %115, %121 : vector<14x14xf32>
    %123 = vector.broadcast %35 : f32 to vector<14x14xf32>
    %124 = arith.mulf %123, %119 : vector<14x14xf32>
    %125 = arith.addf %118, %124 : vector<14x14xf32>
    %c0_4 = arith.constant 0 : index
    %c1_5 = arith.constant 1 : index
    %c0_6 = arith.constant 0 : index
    %c0_7 = arith.constant 0 : index
    %126 = vector.load %arg0[%c0_4, %c1_5, %c0_6, %c0_7] : memref<2x3x16x16xf32, #tpu.memory_space<vmem>>, vector<1x1x16x16xf32>
    %127 = vector.shape_cast %126 : vector<1x1x16x16xf32> to vector<16x16xf32>
    %128 = vector.extract_strided_slice %127 {offsets = [0, 0], sizes = [14, 16], strides = [1, 1]} : vector<16x16xf32> to vector<14x16xf32>
    %129 = vector.extract_strided_slice %128 {offsets = [0, 0], sizes = [14, 14], strides = [1, 1]} : vector<14x16xf32> to vector<14x14xf32>
    %130 = vector.broadcast %9 : f32 to vector<14x14xf32>
    %131 = arith.mulf %130, %129 : vector<14x14xf32>
    %132 = arith.addf %122, %131 : vector<14x14xf32>
    %133 = vector.broadcast %36 : f32 to vector<14x14xf32>
    %134 = arith.mulf %133, %129 : vector<14x14xf32>
    %135 = arith.addf %125, %134 : vector<14x14xf32>
    %136 = vector.extract_strided_slice %128 {offsets = [0, 1], sizes = [14, 14], strides = [1, 1]} : vector<14x16xf32> to vector<14x14xf32>
    %137 = vector.broadcast %10 : f32 to vector<14x14xf32>
    %138 = arith.mulf %137, %136 : vector<14x14xf32>
    %139 = arith.addf %132, %138 : vector<14x14xf32>
    %140 = vector.broadcast %37 : f32 to vector<14x14xf32>
    %141 = arith.mulf %140, %136 : vector<14x14xf32>
    %142 = arith.addf %135, %141 : vector<14x14xf32>
    %143 = vector.extract_strided_slice %128 {offsets = [0, 2], sizes = [14, 14], strides = [1, 1]} : vector<14x16xf32> to vector<14x14xf32>
    %144 = vector.broadcast %11 : f32 to vector<14x14xf32>
    %145 = arith.mulf %144, %143 : vector<14x14xf32>
    %146 = arith.addf %139, %145 : vector<14x14xf32>
    %147 = vector.broadcast %38 : f32 to vector<14x14xf32>
    %148 = arith.mulf %147, %143 : vector<14x14xf32>
    %149 = arith.addf %142, %148 : vector<14x14xf32>
    %150 = vector.extract_strided_slice %127 {offsets = [1, 0], sizes = [14, 16], strides = [1, 1]} : vector<16x16xf32> to vector<14x16xf32>
    %151 = vector.extract_strided_slice %150 {offsets = [0, 0], sizes = [14, 14], strides = [1, 1]} : vector<14x16xf32> to vector<14x14xf32>
    %152 = vector.broadcast %12 : f32 to vector<14x14xf32>
    %153 = arith.mulf %152, %151 : vector<14x14xf32>
    %154 = arith.addf %146, %153 : vector<14x14xf32>
    %155 = vector.broadcast %39 : f32 to vector<14x14xf32>
    %156 = arith.mulf %155, %151 : vector<14x14xf32>
    %157 = arith.addf %149, %156 : vector<14x14xf32>
    %158 = vector.extract_strided_slice %150 {offsets = [0, 1], sizes = [14, 14], strides = [1, 1]} : vector<14x16xf32> to vector<14x14xf32>
    %159 = vector.broadcast %13 : f32 to vector<14x14xf32>
    %160 = arith.mulf %159, %158 : vector<14x14xf32>
    %161 = arith.addf %154, %160 : vector<14x14xf32>
    %162 = vector.broadcast %40 : f32 to vector<14x14xf32>
    %163 = arith.mulf %162, %158 : vector<14x14xf32>
    %164 = arith.addf %157, %163 : vector<14x14xf32>
    %165 = vector.extract_strided_slice %150 {offsets = [0, 2], sizes = [14, 14], strides = [1, 1]} : vector<14x16xf32> to vector<14x14xf32>
    %166 = vector.broadcast %14 : f32 to vector<14x14xf32>
    %167 = arith.mulf %166, %165 : vector<14x14xf32>
    %168 = arith.addf %161, %167 : vector<14x14xf32>
    %169 = vector.broadcast %41 : f32 to vector<14x14xf32>
    %170 = arith.mulf %169, %165 : vector<14x14xf32>
    %171 = arith.addf %164, %170 : vector<14x14xf32>
    %172 = vector.extract_strided_slice %127 {offsets = [2, 0], sizes = [14, 16], strides = [1, 1]} : vector<16x16xf32> to vector<14x16xf32>
    %173 = vector.extract_strided_slice %172 {offsets = [0, 0], sizes = [14, 14], strides = [1, 1]} : vector<14x16xf32> to vector<14x14xf32>
    %174 = vector.broadcast %15 : f32 to vector<14x14xf32>
    %175 = arith.mulf %174, %173 : vector<14x14xf32>
    %176 = arith.addf %168, %175 : vector<14x14xf32>
    %177 = vector.broadcast %42 : f32 to vector<14x14xf32>
    %178 = arith.mulf %177, %173 : vector<14x14xf32>
    %179 = arith.addf %171, %178 : vector<14x14xf32>
    %180 = vector.extract_strided_slice %172 {offsets = [0, 1], sizes = [14, 14], strides = [1, 1]} : vector<14x16xf32> to vector<14x14xf32>
    %181 = vector.broadcast %16 : f32 to vector<14x14xf32>
    %182 = arith.mulf %181, %180 : vector<14x14xf32>
    %183 = arith.addf %176, %182 : vector<14x14xf32>
    %184 = vector.broadcast %43 : f32 to vector<14x14xf32>
    %185 = arith.mulf %184, %180 : vector<14x14xf32>
    %186 = arith.addf %179, %185 : vector<14x14xf32>
    %187 = vector.extract_strided_slice %172 {offsets = [0, 2], sizes = [14, 14], strides = [1, 1]} : vector<14x16xf32> to vector<14x14xf32>
    %188 = vector.broadcast %17 : f32 to vector<14x14xf32>
    %189 = arith.mulf %188, %187 : vector<14x14xf32>
    %190 = arith.addf %183, %189 : vector<14x14xf32>
    %191 = vector.broadcast %44 : f32 to vector<14x14xf32>
    %192 = arith.mulf %191, %187 : vector<14x14xf32>
    %193 = arith.addf %186, %192 : vector<14x14xf32>
    %c0_8 = arith.constant 0 : index
    %c2_9 = arith.constant 2 : index
    %c0_10 = arith.constant 0 : index
    %c0_11 = arith.constant 0 : index
    %194 = vector.load %arg0[%c0_8, %c2_9, %c0_10, %c0_11] : memref<2x3x16x16xf32, #tpu.memory_space<vmem>>, vector<1x1x16x16xf32>
    %195 = vector.shape_cast %194 : vector<1x1x16x16xf32> to vector<16x16xf32>
    %196 = vector.extract_strided_slice %195 {offsets = [0, 0], sizes = [14, 16], strides = [1, 1]} : vector<16x16xf32> to vector<14x16xf32>
    %197 = vector.extract_strided_slice %196 {offsets = [0, 0], sizes = [14, 14], strides = [1, 1]} : vector<14x16xf32> to vector<14x14xf32>
    %198 = vector.broadcast %18 : f32 to vector<14x14xf32>
    %199 = arith.mulf %198, %197 : vector<14x14xf32>
    %200 = arith.addf %190, %199 : vector<14x14xf32>
    %201 = vector.broadcast %45 : f32 to vector<14x14xf32>
    %202 = arith.mulf %201, %197 : vector<14x14xf32>
    %203 = arith.addf %193, %202 : vector<14x14xf32>
    %204 = vector.extract_strided_slice %196 {offsets = [0, 1], sizes = [14, 14], strides = [1, 1]} : vector<14x16xf32> to vector<14x14xf32>
    %205 = vector.broadcast %19 : f32 to vector<14x14xf32>
    %206 = arith.mulf %205, %204 : vector<14x14xf32>
    %207 = arith.addf %200, %206 : vector<14x14xf32>
    %208 = vector.broadcast %46 : f32 to vector<14x14xf32>
    %209 = arith.mulf %208, %204 : vector<14x14xf32>
    %210 = arith.addf %203, %209 : vector<14x14xf32>
    %211 = vector.extract_strided_slice %196 {offsets = [0, 2], sizes = [14, 14], strides = [1, 1]} : vector<14x16xf32> to vector<14x14xf32>
    %212 = vector.broadcast %20 : f32 to vector<14x14xf32>
    %213 = arith.mulf %212, %211 : vector<14x14xf32>
    %214 = arith.addf %207, %213 : vector<14x14xf32>
    %215 = vector.broadcast %47 : f32 to vector<14x14xf32>
    %216 = arith.mulf %215, %211 : vector<14x14xf32>
    %217 = arith.addf %210, %216 : vector<14x14xf32>
    %218 = vector.extract_strided_slice %195 {offsets = [1, 0], sizes = [14, 16], strides = [1, 1]} : vector<16x16xf32> to vector<14x16xf32>
    %219 = vector.extract_strided_slice %218 {offsets = [0, 0], sizes = [14, 14], strides = [1, 1]} : vector<14x16xf32> to vector<14x14xf32>
    %220 = vector.broadcast %21 : f32 to vector<14x14xf32>
    %221 = arith.mulf %220, %219 : vector<14x14xf32>
    %222 = arith.addf %214, %221 : vector<14x14xf32>
    %223 = vector.broadcast %48 : f32 to vector<14x14xf32>
    %224 = arith.mulf %223, %219 : vector<14x14xf32>
    %225 = arith.addf %217, %224 : vector<14x14xf32>
    %226 = vector.extract_strided_slice %218 {offsets = [0, 1], sizes = [14, 14], strides = [1, 1]} : vector<14x16xf32> to vector<14x14xf32>
    %227 = vector.broadcast %22 : f32 to vector<14x14xf32>
    %228 = arith.mulf %227, %226 : vector<14x14xf32>
    %229 = arith.addf %222, %228 : vector<14x14xf32>
    %230 = vector.broadcast %49 : f32 to vector<14x14xf32>
    %231 = arith.mulf %230, %226 : vector<14x14xf32>
    %232 = arith.addf %225, %231 : vector<14x14xf32>
    %233 = vector.extract_strided_slice %218 {offsets = [0, 2], sizes = [14, 14], strides = [1, 1]} : vector<14x16xf32> to vector<14x14xf32>
    %234 = vector.broadcast %23 : f32 to vector<14x14xf32>
    %235 = arith.mulf %234, %233 : vector<14x14xf32>
    %236 = arith.addf %229, %235 : vector<14x14xf32>
    %237 = vector.broadcast %50 : f32 to vector<14x14xf32>
    %238 = arith.mulf %237, %233 : vector<14x14xf32>
    %239 = arith.addf %232, %238 : vector<14x14xf32>
    %240 = vector.extract_strided_slice %195 {offsets = [2, 0], sizes = [14, 16], strides = [1, 1]} : vector<16x16xf32> to vector<14x16xf32>
    %241 = vector.extract_strided_slice %240 {offsets = [0, 0], sizes = [14, 14], strides = [1, 1]} : vector<14x16xf32> to vector<14x14xf32>
    %242 = vector.broadcast %24 : f32 to vector<14x14xf32>
    %243 = arith.mulf %242, %241 : vector<14x14xf32>
    %244 = arith.addf %236, %243 : vector<14x14xf32>
    %245 = vector.broadcast %51 : f32 to vector<14x14xf32>
    %246 = arith.mulf %245, %241 : vector<14x14xf32>
    %247 = arith.addf %239, %246 : vector<14x14xf32>
    %248 = vector.extract_strided_slice %240 {offsets = [0, 1], sizes = [14, 14], strides = [1, 1]} : vector<14x16xf32> to vector<14x14xf32>
    %249 = vector.broadcast %25 : f32 to vector<14x14xf32>
    %250 = arith.mulf %249, %248 : vector<14x14xf32>
    %251 = arith.addf %244, %250 : vector<14x14xf32>
    %252 = vector.broadcast %52 : f32 to vector<14x14xf32>
    %253 = arith.mulf %252, %248 : vector<14x14xf32>
    %254 = arith.addf %247, %253 : vector<14x14xf32>
    %255 = vector.extract_strided_slice %240 {offsets = [0, 2], sizes = [14, 14], strides = [1, 1]} : vector<14x16xf32> to vector<14x14xf32>
    %256 = vector.broadcast %26 : f32 to vector<14x14xf32>
    %257 = arith.mulf %256, %255 : vector<14x14xf32>
    %258 = arith.addf %251, %257 : vector<14x14xf32>
    %259 = vector.broadcast %53 : f32 to vector<14x14xf32>
    %260 = arith.mulf %259, %255 : vector<14x14xf32>
    %261 = arith.addf %254, %260 : vector<14x14xf32>
    %c0_12 = arith.constant 0 : index
    %c0_13 = arith.constant 0 : index
    %c0_14 = arith.constant 0 : index
    %c0_15 = arith.constant 0 : index
    %262 = vector.load %arg2[%c0_12, %c0_13, %c0_14, %c0_15] : memref<2x2x14x14xf32, #tpu.memory_space<vmem>>, vector<1x1x14x14xf32>
    %263 = vector.shape_cast %262 : vector<1x1x14x14xf32> to vector<14x14xf32>
    %264 = vector.shape_cast %258 : vector<14x14xf32> to vector<1x1x14x14xf32>
    tpu.vector_store %arg2[%c0_12, %c0_13, %c0_14, %c0_15], %264 {strides = array<i32>} : memref<2x2x14x14xf32, #tpu.memory_space<vmem>>, vector<1x1x14x14xf32>,
    %c0_16 = arith.constant 0 : index
    %c1_17 = arith.constant 1 : index
    %c0_18 = arith.constant 0 : index
    %c0_19 = arith.constant 0 : index
    %265 = vector.load %arg2[%c0_16, %c1_17, %c0_18, %c0_19] : memref<2x2x14x14xf32, #tpu.memory_space<vmem>>, vector<1x1x14x14xf32>
    %266 = vector.shape_cast %265 : vector<1x1x14x14xf32> to vector<14x14xf32>
    %267 = vector.shape_cast %261 : vector<14x14xf32> to vector<1x1x14x14xf32>
    tpu.vector_store %arg2[%c0_16, %c1_17, %c0_18, %c0_19], %267 {strides = array<i32>} : memref<2x2x14x14xf32, #tpu.memory_space<vmem>>, vector<1x1x14x14xf32>,
    %268 = vector.broadcast %54 : f32 to vector<14x14xf32>
    %269 = vector.broadcast %55 : f32 to vector<14x14xf32>
    %c1_20 = arith.constant 1 : index
    %c0_21 = arith.constant 0 : index
    %c0_22 = arith.constant 0 : index
    %c0_23 = arith.constant 0 : index
    %270 = vector.load %arg0[%c1_20, %c0_21, %c0_22, %c0_23] : memref<2x3x16x16xf32, #tpu.memory_space<vmem>>, vector<1x1x16x16xf32>
    %271 = vector.shape_cast %270 : vector<1x1x16x16xf32> to vector<16x16xf32>
    %272 = vector.extract_strided_slice %271 {offsets = [0, 0], sizes = [14, 16], strides = [1, 1]} : vector<16x16xf32> to vector<14x16xf32>
    %273 = vector.extract_strided_slice %272 {offsets = [0, 0], sizes = [14, 14], strides = [1, 1]} : vector<14x16xf32> to vector<14x14xf32>
    %274 = vector.broadcast %0 : f32 to vector<14x14xf32>
    %275 = arith.mulf %274, %273 : vector<14x14xf32>
    %276 = arith.addf %268, %275 : vector<14x14xf32>
    %277 = vector.broadcast %27 : f32 to vector<14x14xf32>
    %278 = arith.mulf %277, %273 : vector<14x14xf32>
    %279 = arith.addf %269, %278 : vector<14x14xf32>
    %280 = vector.extract_strided_slice %272 {offsets = [0, 1], sizes = [14, 14], strides = [1, 1]} : vector<14x16xf32> to vector<14x14xf32>
    %281 = vector.broadcast %1 : f32 to vector<14x14xf32>
    %282 = arith.mulf %281, %280 : vector<14x14xf32>
    %283 = arith.addf %276, %282 : vector<14x14xf32>
    %284 = vector.broadcast %28 : f32 to vector<14x14xf32>
    %285 = arith.mulf %284, %280 : vector<14x14xf32>
    %286 = arith.addf %279, %285 : vector<14x14xf32>
    %287 = vector.extract_strided_slice %272 {offsets = [0, 2], sizes = [14, 14], strides = [1, 1]} : vector<14x16xf32> to vector<14x14xf32>
    %288 = vector.broadcast %2 : f32 to vector<14x14xf32>
    %289 = arith.mulf %288, %287 : vector<14x14xf32>
    %290 = arith.addf %283, %289 : vector<14x14xf32>
    %291 = vector.broadcast %29 : f32 to vector<14x14xf32>
    %292 = arith.mulf %291, %287 : vector<14x14xf32>
    %293 = arith.addf %286, %292 : vector<14x14xf32>
    %294 = vector.extract_strided_slice %271 {offsets = [1, 0], sizes = [14, 16], strides = [1, 1]} : vector<16x16xf32> to vector<14x16xf32>
    %295 = vector.extract_strided_slice %294 {offsets = [0, 0], sizes = [14, 14], strides = [1, 1]} : vector<14x16xf32> to vector<14x14xf32>
    %296 = vector.broadcast %3 : f32 to vector<14x14xf32>
    %297 = arith.mulf %296, %295 : vector<14x14xf32>
    %298 = arith.addf %290, %297 : vector<14x14xf32>
    %299 = vector.broadcast %30 : f32 to vector<14x14xf32>
    %300 = arith.mulf %299, %295 : vector<14x14xf32>
    %301 = arith.addf %293, %300 : vector<14x14xf32>
    %302 = vector.extract_strided_slice %294 {offsets = [0, 1], sizes = [14, 14], strides = [1, 1]} : vector<14x16xf32> to vector<14x14xf32>
    %303 = vector.broadcast %4 : f32 to vector<14x14xf32>
    %304 = arith.mulf %303, %302 : vector<14x14xf32>
    %305 = arith.addf %298, %304 : vector<14x14xf32>
    %306 = vector.broadcast %31 : f32 to vector<14x14xf32>
    %307 = arith.mulf %306, %302 : vector<14x14xf32>
    %308 = arith.addf %301, %307 : vector<14x14xf32>
    %309 = vector.extract_strided_slice %294 {offsets = [0, 2], sizes = [14, 14], strides = [1, 1]} : vector<14x16xf32> to vector<14x14xf32>
    %310 = vector.broadcast %5 : f32 to vector<14x14xf32>
    %311 = arith.mulf %310, %309 : vector<14x14xf32>
    %312 = arith.addf %305, %311 : vector<14x14xf32>
    %313 = vector.broadcast %32 : f32 to vector<14x14xf32>
    %314 = arith.mulf %313, %309 : vector<14x14xf32>
    %315 = arith.addf %308, %314 : vector<14x14xf32>
    %316 = vector.extract_strided_slice %271 {offsets = [2, 0], sizes = [14, 16], strides = [1, 1]} : vector<16x16xf32> to vector<14x16xf32>
    %317 = vector.extract_strided_slice %316 {offsets = [0, 0], sizes = [14, 14], strides = [1, 1]} : vector<14x16xf32> to vector<14x14xf32>
    %318 = vector.broadcast %6 : f32 to vector<14x14xf32>
    %319 = arith.mulf %318, %317 : vector<14x14xf32>
    %320 = arith.addf %312, %319 : vector<14x14xf32>
    %321 = vector.broadcast %33 : f32 to vector<14x14xf32>
    %322 = arith.mulf %321, %317 : vector<14x14xf32>
    %323 = arith.addf %315, %322 : vector<14x14xf32>
    %324 = vector.extract_strided_slice %316 {offsets = [0, 1], sizes = [14, 14], strides = [1, 1]} : vector<14x16xf32> to vector<14x14xf32>
    %325 = vector.broadcast %7 : f32 to vector<14x14xf32>
    %326 = arith.mulf %325, %324 : vector<14x14xf32>
    %327 = arith.addf %320, %326 : vector<14x14xf32>
    %328 = vector.broadcast %34 : f32 to vector<14x14xf32>
    %329 = arith.mulf %328, %324 : vector<14x14xf32>
    %330 = arith.addf %323, %329 : vector<14x14xf32>
    %331 = vector.extract_strided_slice %316 {offsets = [0, 2], sizes = [14, 14], strides = [1, 1]} : vector<14x16xf32> to vector<14x14xf32>
    %332 = vector.broadcast %8 : f32 to vector<14x14xf32>
    %333 = arith.mulf %332, %331 : vector<14x14xf32>
    %334 = arith.addf %327, %333 : vector<14x14xf32>
    %335 = vector.broadcast %35 : f32 to vector<14x14xf32>
    %336 = arith.mulf %335, %331 : vector<14x14xf32>
    %337 = arith.addf %330, %336 : vector<14x14xf32>
    %c1_24 = arith.constant 1 : index
    %c1_25 = arith.constant 1 : index
    %c0_26 = arith.constant 0 : index
    %c0_27 = arith.constant 0 : index
    %338 = vector.load %arg0[%c1_24, %c1_25, %c0_26, %c0_27] : memref<2x3x16x16xf32, #tpu.memory_space<vmem>>, vector<1x1x16x16xf32>
    %339 = vector.shape_cast %338 : vector<1x1x16x16xf32> to vector<16x16xf32>
    %340 = vector.extract_strided_slice %339 {offsets = [0, 0], sizes = [14, 16], strides = [1, 1]} : vector<16x16xf32> to vector<14x16xf32>
    %341 = vector.extract_strided_slice %340 {offsets = [0, 0], sizes = [14, 14], strides = [1, 1]} : vector<14x16xf32> to vector<14x14xf32>
    %342 = vector.broadcast %9 : f32 to vector<14x14xf32>
    %343 = arith.mulf %342, %341 : vector<14x14xf32>
    %344 = arith.addf %334, %343 : vector<14x14xf32>
    %345 = vector.broadcast %36 : f32 to vector<14x14xf32>
    %346 = arith.mulf %345, %341 : vector<14x14xf32>
    %347 = arith.addf %337, %346 : vector<14x14xf32>
    %348 = vector.extract_strided_slice %340 {offsets = [0, 1], sizes = [14, 14], strides = [1, 1]} : vector<14x16xf32> to vector<14x14xf32>
    %349 = vector.broadcast %10 : f32 to vector<14x14xf32>
    %350 = arith.mulf %349, %348 : vector<14x14xf32>
    %351 = arith.addf %344, %350 : vector<14x14xf32>
    %352 = vector.broadcast %37 : f32 to vector<14x14xf32>
    %353 = arith.mulf %352, %348 : vector<14x14xf32>
    %354 = arith.addf %347, %353 : vector<14x14xf32>
    %355 = vector.extract_strided_slice %340 {offsets = [0, 2], sizes = [14, 14], strides = [1, 1]} : vector<14x16xf32> to vector<14x14xf32>
    %356 = vector.broadcast %11 : f32 to vector<14x14xf32>
    %357 = arith.mulf %356, %355 : vector<14x14xf32>
    %358 = arith.addf %351, %357 : vector<14x14xf32>
    %359 = vector.broadcast %38 : f32 to vector<14x14xf32>
    %360 = arith.mulf %359, %355 : vector<14x14xf32>
    %361 = arith.addf %354, %360 : vector<14x14xf32>
    %362 = vector.extract_strided_slice %339 {offsets = [1, 0], sizes = [14, 16], strides = [1, 1]} : vector<16x16xf32> to vector<14x16xf32>
    %363 = vector.extract_strided_slice %362 {offsets = [0, 0], sizes = [14, 14], strides = [1, 1]} : vector<14x16xf32> to vector<14x14xf32>
    %364 = vector.broadcast %12 : f32 to vector<14x14xf32>
    %365 = arith.mulf %364, %363 : vector<14x14xf32>
    %366 = arith.addf %358, %365 : vector<14x14xf32>
    %367 = vector.broadcast %39 : f32 to vector<14x14xf32>
    %368 = arith.mulf %367, %363 : vector<14x14xf32>
    %369 = arith.addf %361, %368 : vector<14x14xf32>
    %370 = vector.extract_strided_slice %362 {offsets = [0, 1], sizes = [14, 14], strides = [1, 1]} : vector<14x16xf32> to vector<14x14xf32>
    %371 = vector.broadcast %13 : f32 to vector<14x14xf32>
    %372 = arith.mulf %371, %370 : vector<14x14xf32>
    %373 = arith.addf %366, %372 : vector<14x14xf32>
    %374 = vector.broadcast %40 : f32 to vector<14x14xf32>
    %375 = arith.mulf %374, %370 : vector<14x14xf32>
    %376 = arith.addf %369, %375 : vector<14x14xf32>
    %377 = vector.extract_strided_slice %362 {offsets = [0, 2], sizes = [14, 14], strides = [1, 1]} : vector<14x16xf32> to vector<14x14xf32>
    %378 = vector.broadcast %14 : f32 to vector<14x14xf32>
    %379 = arith.mulf %378, %377 : vector<14x14xf32>
    %380 = arith.addf %373, %379 : vector<14x14xf32>
    %381 = vector.broadcast %41 : f32 to vector<14x14xf32>
    %382 = arith.mulf %381, %377 : vector<14x14xf32>
    %383 = arith.addf %376, %382 : vector<14x14xf32>
    %384 = vector.extract_strided_slice %339 {offsets = [2, 0], sizes = [14, 16], strides = [1, 1]} : vector<16x16xf32> to vector<14x16xf32>
    %385 = vector.extract_strided_slice %384 {offsets = [0, 0], sizes = [14, 14], strides = [1, 1]} : vector<14x16xf32> to vector<14x14xf32>
    %386 = vector.broadcast %15 : f32 to vector<14x14xf32>
    %387 = arith.mulf %386, %385 : vector<14x14xf32>
    %388 = arith.addf %380, %387 : vector<14x14xf32>
    %389 = vector.broadcast %42 : f32 to vector<14x14xf32>
    %390 = arith.mulf %389, %385 : vector<14x14xf32>
    %391 = arith.addf %383, %390 : vector<14x14xf32>
    %392 = vector.extract_strided_slice %384 {offsets = [0, 1], sizes = [14, 14], strides = [1, 1]} : vector<14x16xf32> to vector<14x14xf32>
    %393 = vector.broadcast %16 : f32 to vector<14x14xf32>
    %394 = arith.mulf %393, %392 : vector<14x14xf32>
    %395 = arith.addf %388, %394 : vector<14x14xf32>
    %396 = vector.broadcast %43 : f32 to vector<14x14xf32>
    %397 = arith.mulf %396, %392 : vector<14x14xf32>
    %398 = arith.addf %391, %397 : vector<14x14xf32>
    %399 = vector.extract_strided_slice %384 {offsets = [0, 2], sizes = [14, 14], strides = [1, 1]} : vector<14x16xf32> to vector<14x14xf32>
    %400 = vector.broadcast %17 : f32 to vector<14x14xf32>
    %401 = arith.mulf %400, %399 : vector<14x14xf32>
    %402 = arith.addf %395, %401 : vector<14x14xf32>
    %403 = vector.broadcast %44 : f32 to vector<14x14xf32>
    %404 = arith.mulf %403, %399 : vector<14x14xf32>
    %405 = arith.addf %398, %404 : vector<14x14xf32>
    %c1_28 = arith.constant 1 : index
    %c2_29 = arith.constant 2 : index
    %c0_30 = arith.constant 0 : index
    %c0_31 = arith.constant 0 : index
    %406 = vector.load %arg0[%c1_28, %c2_29, %c0_30, %c0_31] : memref<2x3x16x16xf32, #tpu.memory_space<vmem>>, vector<1x1x16x16xf32>
    %407 = vector.shape_cast %406 : vector<1x1x16x16xf32> to vector<16x16xf32>
    %408 = vector.extract_strided_slice %407 {offsets = [0, 0], sizes = [14, 16], strides = [1, 1]} : vector<16x16xf32> to vector<14x16xf32>
    %409 = vector.extract_strided_slice %408 {offsets = [0, 0], sizes = [14, 14], strides = [1, 1]} : vector<14x16xf32> to vector<14x14xf32>
    %410 = vector.broadcast %18 : f32 to vector<14x14xf32>
    %411 = arith.mulf %410, %409 : vector<14x14xf32>
    %412 = arith.addf %402, %411 : vector<14x14xf32>
    %413 = vector.broadcast %45 : f32 to vector<14x14xf32>
    %414 = arith.mulf %413, %409 : vector<14x14xf32>
    %415 = arith.addf %405, %414 : vector<14x14xf32>
    %416 = vector.extract_strided_slice %408 {offsets = [0, 1], sizes = [14, 14], strides = [1, 1]} : vector<14x16xf32> to vector<14x14xf32>
    %417 = vector.broadcast %19 : f32 to vector<14x14xf32>
    %418 = arith.mulf %417, %416 : vector<14x14xf32>
    %419 = arith.addf %412, %418 : vector<14x14xf32>
    %420 = vector.broadcast %46 : f32 to vector<14x14xf32>
    %421 = arith.mulf %420, %416 : vector<14x14xf32>
    %422 = arith.addf %415, %421 : vector<14x14xf32>
    %423 = vector.extract_strided_slice %408 {offsets = [0, 2], sizes = [14, 14], strides = [1, 1]} : vector<14x16xf32> to vector<14x14xf32>
    %424 = vector.broadcast %20 : f32 to vector<14x14xf32>
    %425 = arith.mulf %424, %423 : vector<14x14xf32>
    %426 = arith.addf %419, %425 : vector<14x14xf32>
    %427 = vector.broadcast %47 : f32 to vector<14x14xf32>
    %428 = arith.mulf %427, %423 : vector<14x14xf32>
    %429 = arith.addf %422, %428 : vector<14x14xf32>
    %430 = vector.extract_strided_slice %407 {offsets = [1, 0], sizes = [14, 16], strides = [1, 1]} : vector<16x16xf32> to vector<14x16xf32>
    %431 = vector.extract_strided_slice %430 {offsets = [0, 0], sizes = [14, 14], strides = [1, 1]} : vector<14x16xf32> to vector<14x14xf32>
    %432 = vector.broadcast %21 : f32 to vector<14x14xf32>
    %433 = arith.mulf %432, %431 : vector<14x14xf32>
    %434 = arith.addf %426, %433 : vector<14x14xf32>
    %435 = vector.broadcast %48 : f32 to vector<14x14xf32>
    %436 = arith.mulf %435, %431 : vector<14x14xf32>
    %437 = arith.addf %429, %436 : vector<14x14xf32>
    %438 = vector.extract_strided_slice %430 {offsets = [0, 1], sizes = [14, 14], strides = [1, 1]} : vector<14x16xf32> to vector<14x14xf32>
    %439 = vector.broadcast %22 : f32 to vector<14x14xf32>
    %440 = arith.mulf %439, %438 : vector<14x14xf32>
    %441 = arith.addf %434, %440 : vector<14x14xf32>
    %442 = vector.broadcast %49 : f32 to vector<14x14xf32>
    %443 = arith.mulf %442, %438 : vector<14x14xf32>
    %444 = arith.addf %437, %443 : vector<14x14xf32>
    %445 = vector.extract_strided_slice %430 {offsets = [0, 2], sizes = [14, 14], strides = [1, 1]} : vector<14x16xf32> to vector<14x14xf32>
    %446 = vector.broadcast %23 : f32 to vector<14x14xf32>
    %447 = arith.mulf %446, %445 : vector<14x14xf32>
    %448 = arith.addf %441, %447 : vector<14x14xf32>
    %449 = vector.broadcast %50 : f32 to vector<14x14xf32>
    %450 = arith.mulf %449, %445 : vector<14x14xf32>
    %451 = arith.addf %444, %450 : vector<14x14xf32>
    %452 = vector.extract_strided_slice %407 {offsets = [2, 0], sizes = [14, 16], strides = [1, 1]} : vector<16x16xf32> to vector<14x16xf32>
    %453 = vector.extract_strided_slice %452 {offsets = [0, 0], sizes = [14, 14], strides = [1, 1]} : vector<14x16xf32> to vector<14x14xf32>
    %454 = vector.broadcast %24 : f32 to vector<14x14xf32>
    %455 = arith.mulf %454, %453 : vector<14x14xf32>
    %456 = arith.addf %448, %455 : vector<14x14xf32>
    %457 = vector.broadcast %51 : f32 to vector<14x14xf32>
    %458 = arith.mulf %457, %453 : vector<14x14xf32>
    %459 = arith.addf %451, %458 : vector<14x14xf32>
    %460 = vector.extract_strided_slice %452 {offsets = [0, 1], sizes = [14, 14], strides = [1, 1]} : vector<14x16xf32> to vector<14x14xf32>
    %461 = vector.broadcast %25 : f32 to vector<14x14xf32>
    %462 = arith.mulf %461, %460 : vector<14x14xf32>
    %463 = arith.addf %456, %462 : vector<14x14xf32>
    %464 = vector.broadcast %52 : f32 to vector<14x14xf32>
    %465 = arith.mulf %464, %460 : vector<14x14xf32>
    %466 = arith.addf %459, %465 : vector<14x14xf32>
    %467 = vector.extract_strided_slice %452 {offsets = [0, 2], sizes = [14, 14], strides = [1, 1]} : vector<14x16xf32> to vector<14x14xf32>
    %468 = vector.broadcast %26 : f32 to vector<14x14xf32>
    %469 = arith.mulf %468, %467 : vector<14x14xf32>
    %470 = arith.addf %463, %469 : vector<14x14xf32>
    %471 = vector.broadcast %53 : f32 to vector<14x14xf32>
    %472 = arith.mulf %471, %467 : vector<14x14xf32>
    %473 = arith.addf %466, %472 : vector<14x14xf32>
    %c1_32 = arith.constant 1 : index
    %c0_33 = arith.constant 0 : index
    %c0_34 = arith.constant 0 : index
    %c0_35 = arith.constant 0 : index
    %474 = vector.load %arg2[%c1_32, %c0_33, %c0_34, %c0_35] : memref<2x2x14x14xf32, #tpu.memory_space<vmem>>, vector<1x1x14x14xf32>
    %475 = vector.shape_cast %474 : vector<1x1x14x14xf32> to vector<14x14xf32>
    %476 = vector.shape_cast %470 : vector<14x14xf32> to vector<1x1x14x14xf32>
    tpu.vector_store %arg2[%c1_32, %c0_33, %c0_34, %c0_35], %476 {strides = array<i32>} : memref<2x2x14x14xf32, #tpu.memory_space<vmem>>, vector<1x1x14x14xf32>,
    %c1_36 = arith.constant 1 : index
    %c1_37 = arith.constant 1 : index
    %c0_38 = arith.constant 0 : index
    %c0_39 = arith.constant 0 : index
    %477 = vector.load %arg2[%c1_36, %c1_37, %c0_38, %c0_39] : memref<2x2x14x14xf32, #tpu.memory_space<vmem>>, vector<1x1x14x14xf32>
    %478 = vector.shape_cast %477 : vector<1x1x14x14xf32> to vector<14x14xf32>
    %479 = vector.shape_cast %473 : vector<14x14xf32> to vector<1x1x14x14xf32>
    tpu.vector_store %arg2[%c1_36, %c1_37, %c0_38, %c0_39], %479 {strides = array<i32>} : memref<2x2x14x14xf32, #tpu.memory_space<vmem>>, vector<1x1x14x14xf32>,
    return
  }
}

</mosaic_0001>

<bundles_post_ra>
// kernel: model_forward.1
= control target key start
LH: loop header
LB: loop body
LE: loop exit
PB: predicated region body
PF: predicated region fallthrough
CT: control target
= control target key end

     0   :  { %7 = vsyncpa [#allocation3], 0  ;;  %s2692_s0 = inlined_call_operand.vmem [shape: f32[2,3,16,16], index: 0, kind: input, shape index: {}]   ;;  %s2693_s1 = inlined_call_operand.vmem [shape: f32[56], index: 1, kind: input, shape index: {}]   ;;  %s2694_s2 = inlined_call_operand.vmem [shape: f32[2,2,14,14], index: 2, kind: output, shape index: {}]  }
   0x1   :  { %s16_s11 = sshll.u32 %s2693_s1, 4  ;;  %s17_s11 = int_to_ptr.vmem [resolvable:$true] %s16_s11 }
   0x2   :  { %s1567_s12 = scalar_lea.vmem %s17_s11, 16  ;;  %p1572_p1 = scmp.lt.s32.totalorder %s17_s11, %s17_s11 }
   0x3   :  { %p1568_p0 = scmp.ne.s32.totalorder %s17_s11, %s1567_s12  ;;  %p1573_p2 = scmp.lt.s32.totalorder %s1567_s12, %s1567_s12 }
   0x5   :  { %p1574_p3 = por %p1573_p2, %p1572_p1 }
   0x7   :  { %p1575_p4 = pnand %p1574_p3, %p1568_p0 }
   0x9   :  { %1578 = shalt.err (!%p1575_p4)
}
   0xa   :  { %s1581_s13 = smov [#allocation2]  }
   0xb   :  { %19 = dma.vmem_to_smem %s17_s11, 16, %s1581_s13, [#allocation3]  }
   0xc   :  { %1579 = dma.done.wait [#allocation3], 16  }
   0xd   :  { %1580 = vsyncadd [#allocation3], 4294967280 }
   0xe   :  { %23 = sfence }
   0xf   :  { %s1520_s14 = sld [smem:[#allocation2 + $0x1d]]  ;;  %v1605_v0 = vld [vmem:[%s2692_s0] sm:$0xff]  ;;  %v1612_v2 = vld [vmem:[%s2692_s0 + $0x8] sm:$0xff]  ;;  %s1582_s23 = smov 127   ;;  %vm151_vm0 = vcmask 1046528   ;;  %vm240_vm1 = vcmask 1045504  }
  0x10   :  { %s1493_s15 = sld [smem:[#allocation2 + $0x1]]  ;;  %s1583_s26 = smov 126   ;;  %v1718_v62 = vld [vmem:[%s2692_s0 + $0x18] sm:$0xff]  ;;  %vm808_vm2 = vcmask 111616   ;;  %vm806_vm3 = vcmask 113664  }
  0x11   :  { %s1494_s16 = sld [smem:[#allocation2 + $0x2]] }
  0x12   :  { %s1496_s1 = sld [smem:[#allocation2 + $0x4]] }
  0x13   :  { %s1521_s21 = sld [smem:[#allocation2 + $0x1e]] }
  0x14   :  { %s1523_s22 = sld [smem:[#allocation2 + $0x20]] }
  0x15   :  { %v1607_v1 = vstv %s1520_s14  ;;  %s1497_s24 = sld [smem:[#allocation2 + $0x5]] }
  0x16   :  { %v108_v3 = vmul.f32 %v1607_v1, %v1605_v0  ;;  %v1616_v4 = vstv %s1493_s15  ;;  %v109_v6 = vmul.f32 %v1607_v1, %v1612_v2  ;;  %s1524_s25 = sld [smem:[#allocation2 + $0x21]] }
  0x17   :  { %v95_v5 = vmul.f32 %v1616_v4, %v1605_v0  ;;  %v96_v7 = vmul.f32 %v1616_v4, %v1612_v2  ;;  %v1626_v8 = vstv %s1494_s16  ;;  %s1499_s27 = sld [smem:[#allocation2 + $0x7]] }
  0x18   :  { %112 = vrot.lane.b32.xlu1 %v108_v3, %s1582_s23  ;;  %v1628_v9 = vstv %s1496_s1  ;;  %v122_v10 = vmul.f32 %v1626_v8, %v1612_v2  ;;  %v121_v11 = vmul.f32 %v1626_v8, %v1605_v0  ;;  %s1526_s28 = sld [smem:[#allocation2 + $0x23]] }
  0x19   :  { %99 = vrot.lane.b32.xlu0 %v95_v5, %s1582_s23  ;;  %v1636_v12 = vstv %s1521_s21  ;;  %v173_v13 = vmul.f32 %v1628_v9, %v1612_v2  ;;  %v172_v14 = vmul.f32 %v1628_v9, %v1605_v0  ;;  %s1500_s29 = sld [smem:[#allocation2 + $0x8]] }
  0x1a   :  { %v1642_v15 = vstv %s1523_s22  ;;  %v135_v16 = vmul.f32 %v1636_v12, %v1612_v2  ;;  %v134_v17 = vmul.f32 %v1636_v12, %v1605_v0  ;;  %s1527_s30 = sld [smem:[#allocation2 + $0x24]] }
  0x1b   :  { %v189_v18 = vmul.f32 %v1642_v15, %v1612_v2  ;;  %v177_v19 = vrot.slane %v173_v13, 1  ;;  %v176_v20 = vrot.slane %v172_v14, 1  ;;  %v188_v21 = vmul.f32 %v1642_v15, %v1605_v0  ;;  %s1495_s3 = sld [smem:[#allocation2 + $0x3]] }
  0x1c   :  { %114 = vrot.lane.b32.xlu1 %v109_v6, %s1582_s23  ;;  %v1654_v22 = vstv %s1497_s24  ;;  %v1663_v28 = vstv %s1524_s25  ;;  %s1502_s4 = sld [smem:[#allocation2 + $0xa]]  ;;  %v1730_v6 = vld [vmem:[%s2692_s0 + $0x10] sm:$0xff] }
  0x1d   :  { %101 = vrot.lane.b32.xlu0 %v96_v7, %s1582_s23  ;;  %v205_v23 = vmul.f32 %v1654_v22, %v1612_v2  ;;  %v178_v24 = vsel %vm151_vm0, %v176_v20, %v177_v19  ;;  %v193_v25 = vrot.slane %v189_v18, 1  ;;  %v192_v26 = vrot.slane %v188_v21, 1  ;;  %s1522_s5 = sld [smem:[#allocation2 + $0x1f]] }
  0x1e   :  { %v204_v27 = vmul.f32 %v1654_v22, %v1605_v0  ;;  %v1667_v30 = vstv %s1499_s27  ;;  %v221_v33 = vmul.f32 %v1663_v28, %v1612_v2  ;;  %v220_v34 = vmul.f32 %v1663_v28, %v1605_v0  ;;  %s1529_s6 = sld [smem:[#allocation2 + $0x26]] }
  0x1f   :  { %v209_v29 = vrot.slane %v205_v23, 1  ;;  %v194_v31 = vsel %vm151_vm0, %v192_v26, %v193_v25  ;;  %v262_v35 = vmul.f32 %v1667_v30, %v1612_v2  ;;  %v261_v39 = vmul.f32 %v1667_v30, %v1605_v0  ;;  %s1503_s7 = sld [smem:[#allocation2 + $0xb]] }
  0x20   :  { %127 = vrot.lane.b32.xlu1 %v122_v10, %s1583_s26  ;;  %v208_v32 = vrot.slane %v204_v27, 1  ;;  %v225_v37 = vrot.slane %v221_v33, 1  ;;  %v224_v38 = vrot.slane %v220_v34, 1  ;;  %v1681_v40 = vstv %s1526_s28  ;;  %s1498_s10 = sld [smem:[#allocation2 + $0x6]] }
  0x21   :  { %125 = vrot.lane.b32.xlu0 %v121_v11, %s1583_s26  ;;  %v266_v41 = vrot.slane %v262_v35, 2  ;;  %v1685_v42 = vstv %s1500_s29  ;;  %v265_v44 = vrot.slane %v261_v39, 2  ;;  %v278_v45 = vmul.f32 %v1681_v40, %v1612_v2  ;;  %s1505_s13 = sld [smem:[#allocation2 + $0xd]] }
  0x22   :  { %v210_v36 = vsel %vm151_vm0, %v208_v32, %v209_v29  ;;  %v226_v43 = vsel %vm151_vm0, %v224_v38, %v225_v37  ;;  %v277_v46 = vmul.f32 %v1681_v40, %v1605_v0  ;;  %v294_v47 = vmul.f32 %v1685_v42, %v1612_v2  ;;  %s1525_s14 = sld [smem:[#allocation2 + $0x22]] }
  0x23   :  { %v293_v48 = vmul.f32 %v1685_v42, %v1605_v0  ;;  %v267_v49 = vsel %vm240_vm1, %v265_v44, %v266_v41  ;;  %v282_v50 = vrot.slane %v278_v45, 2  ;;  %v1699_v52 = vstv %s1527_s30  ;;  %s1530_s15 = sld [smem:[#allocation2 + $0x27]] }
  0x24   :  { %140 = vrot.lane.b32.xlu1 %v135_v16, %s1583_s26  ;;  %v281_v51 = vrot.slane %v277_v46, 2  ;;  %v310_v53 = vmul.f32 %v1699_v52, %v1612_v2  ;;  %v298_v55 = vrot.slane %v294_v47, 2  ;;  %v309_v57 = vmul.f32 %v1699_v52, %v1605_v0  ;;  %s1532_s16 = sld [smem:[#allocation2 + $0x29]] }
  0x25   :  { %138 = vrot.lane.b32.xlu0 %v134_v17, %s1583_s26  ;;  %v297_v56 = vrot.slane %v293_v48, 2  ;;  %v1711_v61 = vstv %s1495_s3  ;;  %v1720_v63 = vstv %s1502_s4  ;;  %v1738_v14 = vstv %s1522_s5  ;;  %s1774_s17 = sld [smem:[#allocation2 + $0xe]] }
  0x26   :  { %v283_v54 = vsel %vm240_vm1, %v281_v51, %v282_v50  ;;  %v314_v59 = vrot.slane %v310_v53, 2  ;;  %v313_v60 = vrot.slane %v309_v57, 2  ;;  %2757 = vst [vmem:[#allocation5_spill] sm:$0xff] %v1711_v61  ;;  %v1724_v3 = vmul.f32 %v1711_v61, %v1612_v2  ;;  %2758 = vst [vmem:[#allocation6_spill] sm:$0xff] %v1738_v14  ;;  %s1533_s18 = sld [smem:[#allocation2 + $0x2a]] }
  0x27   :  { %v299_v58 = vsel %vm240_vm1, %v297_v56, %v298_v55  ;;  %v147_v7 = vmul.f32 %v1711_v61, %v1605_v0  ;;  %v339_v11 = vmul.f32 %v1718_v62, %v1720_v63  ;;  %v338_v16 = vmul.f32 %v1730_v6, %v1720_v63  ;;  %s1504_s1 = sld [smem:[#allocation2 + $0xc]] }
  0x28   :  { %181 = vrot.lane.b32.xlu1 %v177_v19, %s1582_s23  ;;  %v315_v5 = vsel %vm240_vm1, %v313_v60, %v314_v59  ;;  %v2700_v10 = vrot.slane %v1724_v3, 1  ;;  %v1743_v17 = vstv %s1529_s6  ;;  %v1747_v18 = vmul.f32 %v1738_v14, %v1612_v2  ;;  %s1531_s19 = sld [smem:[#allocation2 + $0x28]] }
  0x29   :  { %179 = vrot.lane.b32.xlu0 %v178_v24, %s1582_s23  ;;  %v152_v13 = vrot.slane %v147_v7, 1  ;;  %v160_v19 = vmul.f32 %v1738_v14, %v1605_v0  ;;  %v352_v24 = vmul.f32 %v1718_v62, %v1743_v17  ;;  %v351_v26 = vmul.f32 %v1730_v6, %v1743_v17  ;;  %s1508_s20 = sld [smem:[#allocation2 + $0x10]] }
  0x2a   :  { %v2699_v21 = vrot.slane %v1747_v18, 1  ;;  %v1784_v35 = vstv %s1525_s14  ;;  %v1809_v48 = vstv %s1532_s16  ;;  %s1840_s21 = sld [smem:[#allocation2 + $0xf]] }
  0x2b   :  { %v1754_v20 = vsel %vm151_vm0, %v152_v13, %v2700_v10  ;;  %v164_v23 = vrot.slane %v160_v19, 1  ;;  %2761 = vst [vmem:[#allocation9_spill] sm:$0xff] %v1784_v35  ;;  %v1792_v39 = vmul.f32 %v1784_v35, %v1612_v2  ;;  %v249_v45 = vmul.f32 %v1784_v35, %v1605_v0  ;;  %2763 = vst [vmem:[#allocation11_spill] sm:$0xff] %v1809_v48  ;;  %s1842_s22 = sld [smem:[#allocation2 + $0x2c]] }
  0x2c   :  { %197 = vrot.lane.b32.xlu1 %v193_v25, %s1582_s23  ;;  %v1760_v25 = vstv %s1503_s7  ;;  %v431_v56 = vmul.f32 %v1718_v62, %v1809_v48  ;;  %v430_v57 = vmul.f32 %v1730_v6, %v1809_v48  ;;  %s1850_s24 = sld [smem:[#allocation2 + $0x2b]] }
  0x2d   :  { %195 = vrot.lane.b32.xlu0 %v194_v31, %s1582_s23  ;;  %v1768_v27 = vsel %vm151_vm0, %v164_v23, %v2699_v21  ;;  %v1772_v31 = vstv %s1505_s13  ;;  %v365_v34 = vmul.f32 %v1718_v62, %v1760_v25  ;;  %v2697_v47 = vrot.slane %v1792_v39, 2  ;;  %s1875_s25 = sld [smem:[#allocation2 + $0x11]] }
  0x2e   :  { %2760 = vst [vmem:[#allocation8_spill] sm:$0xff] %v1772_v31  ;;  %v414_v44 = vmul.f32 %v1730_v6, %v1772_v31  ;;  %v435_v13 = vrot.slane %v431_v56, 1  ;;  %s1536_s27 = sld [smem:[#allocation2 + $0x2d]] }
  0x2f   :  { %s1511_s28 = sld [smem:[#allocation2 + $0x13]] }
  0x30   :  { %213 = vrot.lane.b32.xlu1 %v209_v29, %s1583_s26  ;;  %v1770_v29 = vstv %s1498_s10  ;;  %s1538_s29 = sld [smem:[#allocation2 + $0x2f]] }
  0x31   :  { %211 = vrot.lane.b32.xlu0 %v210_v36, %s1583_s26  ;;  %2759 = vst [vmem:[#allocation7_spill] sm:$0xff] %v1770_v29  ;;  %v1778_v32 = vmul.f32 %v1770_v29, %v1612_v2  ;;  %v236_v33 = vmul.f32 %v1770_v29, %v1605_v0  ;;  %v364_v36 = vmul.f32 %v1730_v6, %v1760_v25  ;;  %s1512_s4 = sld [smem:[#allocation2 + $0x14]] }
  0x32   :  { %s1514_s7 = sld [smem:[#allocation2 + $0x16]] }
  0x33   :  { %v241_v38 = vrot.slane %v236_v33, 2  ;;  %s1539_s8 = sld [smem:[#allocation2 + $0x30]] }
  0x34   :  { %229 = vrot.lane.b32.xlu1 %v225_v37, %s1583_s26  ;;  %v2698_v37 = vrot.slane %v1778_v32, 2  ;;  %s1541_s9 = sld [smem:[#allocation2 + $0x32]] }
  0x35   :  { %227 = vrot.lane.b32.xlu0 %v226_v43, %s1583_s26  ;;  %v415_v43 = vmul.f32 %v1718_v62, %v1772_v31  ;;  %s1515_s10 = sld [smem:[#allocation2 + $0x17]] }
  0x36   :  { %v1806_v46 = vsel %vm240_vm1, %v241_v38, %v2698_v37  ;;  %v1861_v38 = vstv %s1508_s20  ;;  %s1519_s11 = sld [smem:[#allocation2 + $0x1c]] }
  0x37   :  { %v419_v53 = vrot.slane %v415_v43, 1  ;;  %2768 = vst [vmem:[#allocation16_spill] sm:$0xff] %v1861_v38  ;;  %s24_s12 = sld [smem:[#allocation2]] }
  0x38   :  { %270 = vrot.lane.b32.xlu1 %v266_v41, %s1582_s23  ;;  %v1795_v41 = vstv %s1530_s15  ;;  %s1542_s13 = sld [smem:[#allocation2 + $0x33]] }
  0x39   :  { %268 = vrot.lane.b32.xlu0 %v267_v49, %s1582_s23  ;;  %2762 = vst [vmem:[#allocation10_spill] sm:$0xff] %v1795_v41  ;;  %v253_v49 = vrot.slane %v249_v45, 2  ;;  %v377_v51 = vmul.f32 %v1730_v6, %v1795_v41  ;;  %s1546_s14 = sld [smem:[#allocation2 + $0x1b]] }
  0x3a   :  { %s1517_s15 = sld [smem:[#allocation2 + $0x19]] }
  0x3b   :  { %v2009_v14 = vstv %s1515_s10  ;;  %s1544_s16 = sld [smem:[#allocation2 + $0x35]] }
  0x3c   :  { %286 = vrot.lane.b32.xlu1 %v282_v50, %s1582_s23  ;;  %v378_v50 = vmul.f32 %v1718_v62, %v1795_v41  ;;  %2780 = vst [vmem:[#allocation28_spill] sm:$0xff] %v2009_v14  ;;  %s1513_s3 = sld [smem:[#allocation2 + $0x15]] }
  0x3d   :  { %284 = vrot.lane.b32.xlu0 %v283_v54, %s1582_s23  ;;  %v418_v54 = vrot.slane %v414_v44, 1  ;;  %s1537_s5 = sld [smem:[#allocation2 + $0x2e]] }
  0x3e   :  { %s2326_s6 = sld [smem:[#allocation2 + $0x31]] }
  0x3f   :  { %v420_v60 = vsel %vm151_vm0, %v418_v54, %v419_v53 }
  0x40   :  { %302 = vrot.lane.b32.xlu1 %v298_v55, %s1583_s26  ;;  %v1820_v55 = vsel %vm240_vm1, %v253_v49, %v2697_v47 }
  0x41   :  { %300 = vrot.lane.b32.xlu0 %v299_v58, %s1583_s26  ;;  %v1827_v58 = vstv %s1774_s17  ;;  %s1547_s17 = sld [smem:[#allocation2 + $0x37]] }
  0x42   :  { %2764 = vst [vmem:[#allocation12_spill] sm:$0xff] %v1827_v58  ;;  %v446_v7 = vmul.f32 %v1730_v6, %v1827_v58 }
  0x44   :  { %318 = vrot.lane.b32.xlu1 %v314_v59, %s1583_s26  ;;  %v1830_v59 = vstv %s1533_s18  ;;  %s1518_s18 = sld [smem:[#allocation2 + $0x1a]] }
  0x45   :  { %316 = vrot.lane.b32.xlu0 %v315_v5, %s1583_s26  ;;  %2765 = vst [vmem:[#allocation13_spill] sm:$0xff] %v1830_v59  ;;  %v447_v5 = vmul.f32 %v1718_v62, %v1827_v58 }
  0x47   :  { %v451_v49 = vrot.slane %v447_v5, 1  ;;  %v502_v5 = vmul.f32 %v1730_v6, %v1861_v38 }
  0x48   :  { %344 = vrot.lane.b32.xlu1 %v339_v11, %s1582_s23  ;;  %v1838_v11 = vstv %s1504_s1  ;;  %s1545_s1 = sld [smem:[#allocation2 + $0x36]] }
  0x49   :  { %342 = vrot.lane.b32.xlu0 %v338_v16, %s1582_s23  ;;  %2766 = vst [vmem:[#allocation14_spill] sm:$0xff] %v1838_v11  ;;  %v434_v16 = vrot.slane %v430_v57, 1  ;;  %v1846_v19 = vmul.f32 %v1718_v62, %v1838_v11  ;;  %v390_v23 = vmul.f32 %v1730_v6, %v1838_v11  ;;  %v503_v57 = vmul.f32 %v1718_v62, %v1861_v38 }
  0x4a   :  { %v506_v37 = vrot.slane %v502_v5, 2  ;;  %v1935_v5 = vstv %s1536_s27  ;;  %v2061_v41 = vstv %s1518_s18 }
  0x4b   :  { %v394_v33 = vrot.slane %v390_v23, 1  ;;  %v436_v45 = vsel %vm151_vm0, %v434_v16, %v435_v13  ;;  %v1890_v16 = vstv %s1840_s21  ;;  %v1894_v23 = vstv %s1842_s22  ;;  %2773 = vst [vmem:[#allocation21_spill] sm:$0xff] %v1935_v5 }
  0x4c   :  { %357 = vrot.lane.b32.xlu1 %v352_v24, %s1582_s23  ;;  %v463_v24 = vmul.f32 %v1718_v62, %v1830_v59  ;;  %2769 = vst [vmem:[#allocation17_spill] sm:$0xff] %v1890_v16  ;;  %2770 = vst [vmem:[#allocation18_spill] sm:$0xff] %v1894_v23  ;;  %v519_v47 = vmul.f32 %v1718_v62, %v1894_v23 }
  0x4d   :  { %355 = vrot.lane.b32.xlu0 %v351_v26, %s1582_s23  ;;  %v2696_v26 = vrot.slane %v1846_v19, 1 }
  0x4e   :  { %v467_v56 = vrot.slane %v463_v24, 1  ;;  %v1898_v24 = vmul.f32 %v1718_v62, %v1890_v16  ;;  %v2066_v31 = vstv %s1545_s1 }
  0x50   :  { %370 = vrot.lane.b32.xlu1 %v365_v34, %s1583_s26  ;;  %v1856_v34 = vstv %s1531_s19 }
  0x51   :  { %368 = vrot.lane.b32.xlu0 %v364_v36, %s1583_s26  ;;  %2767 = vst [vmem:[#allocation15_spill] sm:$0xff] %v1856_v34  ;;  %v462_v36 = vmul.f32 %v1730_v6, %v1830_v59  ;;  %v1865_v43 = vmul.f32 %v1718_v62, %v1856_v34  ;;  %v402_v44 = vmul.f32 %v1730_v6, %v1856_v34 }
  0x53   :  { %v406_v54 = vrot.slane %v402_v44, 1  ;;  %v2703_v44 = vrot.slane %v1898_v24, 2 }
  0x54   :  { %383 = vrot.lane.b32.xlu1 %v378_v50, %s1583_s26  ;;  %v450_v50 = vrot.slane %v446_v7, 1 }
  0x55   :  { %381 = vrot.lane.b32.xlu0 %v377_v51, %s1583_s26  ;;  %v1873_v51 = vsel %vm151_vm0, %v394_v33, %v2696_v26  ;;  %v478_v33 = vmul.f32 %v1730_v6, %v1890_v16  ;;  %v507_v26 = vrot.slane %v503_v57, 2  ;;  %v1997_v16 = vstv %s1541_s9 }
  0x56   :  { %2779 = vst [vmem:[#allocation27_spill] sm:$0xff] %v1997_v16 }
  0x58   :  { %423 = vrot.lane.b32.xlu1 %v419_v53, %s1582_s23  ;;  %v2695_v53 = vrot.slane %v1865_v43, 1 }
  0x59   :  { %421 = vrot.lane.b32.xlu0 %v420_v60, %s1582_s23  ;;  %v466_v60 = vrot.slane %v462_v36, 1  ;;  %v1903_v36 = vstv %s1850_s24  ;;  %s1501_s24 = sld [smem:[#allocation2 + $0x9]] }
  0x5a   :  { %v1887_v7 = vsel %vm151_vm0, %v406_v54, %v2695_v53  ;;  %2771 = vst [vmem:[#allocation19_spill] sm:$0xff] %v1903_v36  ;;  %v490_v54 = vmul.f32 %v1730_v6, %v1903_v36 }
  0x5b   :  { %v468_v53 = vsel %vm151_vm0, %v466_v60, %v467_v56  ;;  %v523_v60 = vrot.slane %v519_v47, 2 }
  0x5c   :  { %439 = vrot.lane.b32.xlu1 %v435_v13, %s1582_s23  ;;  %v452_v13 = vsel %vm151_vm0, %v450_v50, %v451_v49  ;;  %v1909_v50 = vmul.f32 %v1718_v62, %v1903_v36  ;;  %v494_v10 = vrot.slane %v490_v54, 2  ;;  %v1926_v36 = vstv %s1875_s25  ;;  %s1528_s25 = sld [smem:[#allocation2 + $0x25]] }
  0x5d   :  { %437 = vrot.lane.b32.xlu0 %v436_v45, %s1582_s23  ;;  %v482_v45 = vrot.slane %v478_v33, 2  ;;  %2772 = vst [vmem:[#allocation20_spill] sm:$0xff] %v1926_v36  ;;  %v535_v54 = vmul.f32 %v1718_v62, %v1926_v36 }
  0x5e   :  { %v2704_v21 = vrot.slane %v1909_v50, 2 }
  0x5f   :  { %v1922_v33 = vsel %vm240_vm1, %v482_v45, %v2703_v44  ;;  %v534_v44 = vmul.f32 %v1730_v6, %v1926_v36 }
  0x60   :  { %455 = vrot.lane.b32.xlu1 %v451_v49, %s1583_s26  ;;  %v518_v49 = vmul.f32 %v1730_v6, %v1894_v23  ;;  %v1932_v57 = vsel %vm240_vm1, %v494_v10, %v2704_v21  ;;  %v551_v10 = vmul.f32 %v1718_v62, %v1935_v5  ;;  %v2049_v23 = vstv %s1544_s16 }
  0x61   :  { %453 = vrot.lane.b32.xlu0 %v452_v13, %s1583_s26  ;;  %v508_v13 = vsel %vm240_vm1, %v506_v37, %v507_v26  ;;  %v550_v37 = vmul.f32 %v1730_v6, %v1935_v5  ;;  %2783 = vst [vmem:[#allocation31_spill] sm:$0xff] %v2049_v23 }
  0x62   :  { %v522_v45 = vrot.slane %v518_v49, 2  ;;  %v555_v49 = vrot.slane %v551_v10, 2 }
  0x64   :  { %471 = vrot.lane.b32.xlu1 %v467_v56, %s1583_s26  ;;  %v524_v47 = vsel %vm240_vm1, %v522_v45, %v523_v60  ;;  %v538_v56 = vrot.slane %v534_v44, 2  ;;  %v1957_v44 = vld [vmem:[%s2692_s0 + $0x28] sm:$0xff]  ;;  %v1959_v45 = vstv %s1511_s28 }
  0x65   :  { %469 = vrot.lane.b32.xlu0 %v468_v53, %s1583_s26  ;;  %v539_v53 = vrot.slane %v535_v54, 2  ;;  %2774 = vst [vmem:[#allocation22_spill] sm:$0xff] %v1959_v45  ;;  %v1965_v54 = vld [vmem:[%s2692_s0 + $0x20] sm:$0xff]  ;;  %v580_v10 = vmul.f32 %v1957_v44, %v1959_v45  ;;  %v672_v34 = vmul.f32 %v1957_v44, %v1997_v16 }
  0x66   :  { %v671_v11 = vmul.f32 %v1965_v54, %v1997_v16  ;;  %v687_v16 = vmul.f32 %v1965_v54, %v2009_v14  ;;  %v759_v59 = vmul.f32 %v1965_v54, %v2049_v23 }
  0x68   :  { %511 = vrot.lane.b32.xlu1 %v507_v26, %s1582_s23  ;;  %v540_v26 = vsel %vm240_vm1, %v538_v56, %v539_v53 }
  0x69   :  { %509 = vrot.lane.b32.xlu0 %v508_v13, %s1582_s23  ;;  %v554_v13 = vrot.slane %v550_v37, 2 }
  0x6c   :  { %527 = vrot.lane.b32.xlu1 %v523_v60, %s1582_s23  ;;  %v556_v60 = vsel %vm240_vm1, %v554_v13, %v555_v49 }
  0x6d   :  { %525 = vrot.lane.b32.xlu0 %v524_v47, %s1582_s23  ;;  %v579_v47 = vmul.f32 %v1965_v54, %v1959_v45 }
  0x70   :  { %543 = vrot.lane.b32.xlu1 %v539_v53, %s1583_s26  ;;  %v1973_v53 = vstv %s1538_s29 }
  0x71   :  { %541 = vrot.lane.b32.xlu0 %v540_v26, %s1583_s26  ;;  %2775 = vst [vmem:[#allocation23_spill] sm:$0xff] %v1973_v53  ;;  %v593_v56 = vmul.f32 %v1957_v44, %v1973_v53  ;;  %v592_v37 = vmul.f32 %v1965_v54, %v1973_v53  ;;  %v1981_v26 = vstv %s1512_s4  ;;  %s1510_s4 = sld [smem:[#allocation2 + $0x12]] }
  0x72   :  { %2776 = vst [vmem:[#allocation24_spill] sm:$0xff] %v1981_v26  ;;  %v606_v13 = vmul.f32 %v1957_v44, %v1981_v26 }
  0x74   :  { %559 = vrot.lane.b32.xlu1 %v555_v49, %s1583_s26  ;;  %v1983_v49 = vstv %s1514_s7  ;;  %s2339_s7 = sld [smem:[#allocation2 + $0x18]] }
  0x75   :  { %557 = vrot.lane.b32.xlu0 %v556_v60, %s1583_s26  ;;  %2777 = vst [vmem:[#allocation25_spill] sm:$0xff] %v1983_v49  ;;  %v605_v60 = vmul.f32 %v1965_v54, %v1981_v26  ;;  %v655_v21 = vmul.f32 %v1965_v54, %v1983_v49  ;;  %v691_v26 = vrot.slane %v687_v16, 1 }
  0x77   :  { %v659_v29 = vrot.slane %v655_v21, 1  ;;  %v2020_v21 = vstv %s1542_s13 }
  0x78   :  { %585 = vrot.lane.b32.xlu1 %v580_v10, %s1582_s23  ;;  %v1991_v10 = vstv %s1539_s8  ;;  %2781 = vst [vmem:[#allocation29_spill] sm:$0xff] %v2020_v21  ;;  %v704_v53 = vmul.f32 %v1957_v44, %v2020_v21  ;;  %s2373_s8 = sld [smem:[#allocation2 + $0x34]] }
  0x79   :  { %583 = vrot.lane.b32.xlu0 %v579_v47, %s1582_s23  ;;  %2778 = vst [vmem:[#allocation26_spill] sm:$0xff] %v1991_v10  ;;  %v656_v47 = vmul.f32 %v1957_v44, %v1983_v49  ;;  %v688_v49 = vmul.f32 %v1957_v44, %v2009_v14 }
  0x7a   :  { %v708_v36 = vrot.slane %v704_v53, 1 }
  0x7b   :  { %v660_v35 = vrot.slane %v656_v47, 1  ;;  %v2023_v47 = vstv %s1519_s11  ;;  %v692_v14 = vrot.slane %v688_v49, 1 }
  0x7c   :  { %598 = vrot.lane.b32.xlu1 %v593_v56, %s1582_s23  ;;  %v619_v56 = vmul.f32 %v1957_v44, %v1991_v10 }
  0x7d   :  { %596 = vrot.lane.b32.xlu0 %v592_v37, %s1582_s23  ;;  %v618_v37 = vmul.f32 %v1965_v54, %v1991_v10  ;;  %v661_v61 = vsel %vm151_vm0, %v659_v29, %v660_v35  ;;  %v2014_v10 = vstv %s24_s12 }
  0x7e   :  { %v85_v29 = vmul.f32 %v2014_v10, %v1605_v0 }
  0x80   :  { %611 = vrot.lane.b32.xlu1 %v606_v13, %s1583_s26  ;;  %v676_v13 = vrot.slane %v672_v34, 1 }
  0x81   :  { %609 = vrot.lane.b32.xlu0 %v605_v60, %s1583_s26  ;;  %v675_v60 = vrot.slane %v671_v11, 1  ;;  %v2026_v11 = vstv %s1546_s14 }
  0x83   :  { %v677_v34 = vsel %vm151_vm0, %v675_v60, %v676_v13  ;;  %v87_v60 = vadd.f32 %v85_v29, %v2026_v11 }
  0x84   :  { %624 = vrot.lane.b32.xlu1 %v619_v56, %s1583_s26  ;;  %v2031_v56 = vstv %s1517_s15 }
  0x85   :  { %622 = vrot.lane.b32.xlu0 %v618_v37, %s1583_s26  ;;  %2782 = vst [vmem:[#allocation30_spill] sm:$0xff] %v2031_v56  ;;  %v744_v16 = vmul.f32 %v1957_v44, %v2031_v56  ;;  %v743_v49 = vmul.f32 %v1965_v54, %v2031_v56  ;;  %v760_v56 = vmul.f32 %v1957_v44, %v2049_v23 }
  0x87   :  { %v747_v38 = vrot.slane %v743_v49, 2  ;;  %v763_v49 = vrot.slane %v759_v59, 2 }
  0x88   :  { %664 = vrot.lane.b32.xlu1 %v660_v35, %s1582_s23  ;;  %v703_v35 = vmul.f32 %v1965_v54, %v2020_v21  ;;  %v693_v21 = vsel %vm151_vm0, %v691_v26, %v692_v14 }
  0x89   :  { %662 = vrot.lane.b32.xlu0 %v661_v61, %s1582_s23  ;;  %v90_v61 = vmul.f32 %v2023_v47, %v1605_v0  ;;  %v2051_v0 = vstv %s1547_s17 }
  0x8a   :  { %v113_v37 = vpop.permute.xlu1 %112 }
  0x8b   :  { %v100_v45 = vpop.permute.xlu0 %99  ;;  %v92_v53 = vadd.f32 %v90_v61, %v2051_v0 }
  0x8c   :  { %680 = vrot.lane.b32.xlu1 %v676_v13, %s1582_s23  ;;  %v707_v13 = vrot.slane %v703_v35, 1  ;;  %v105_v26 = vadd.f32 %v100_v45, %v87_v60  ;;  %v776_v60 = vmul.f32 %v1957_v44, %v2061_v41 }
  0x8d   :  { %678 = vrot.lane.b32.xlu0 %v677_v34, %s1582_s23  ;;  %v748_v34 = vrot.slane %v744_v16, 2  ;;  %v764_v16 = vrot.slane %v760_v56, 2  ;;  %v118_v23 = vadd.f32 %v113_v37, %v92_v53 }
  0x8e   :  { %v2046_v5 = vpop.permute.xlu1 %114  ;;  %v709_v58 = vsel %vm151_vm0, %v707_v13, %v708_v36  ;;  %v780_v37 = vrot.slane %v776_v60, 2 }
  0x8f   :  { %v102_v29 = vpop.permute.xlu0 %101  ;;  %v765_v59 = vsel %vm240_vm1, %v763_v49, %v764_v16 }
  0x90   :  { %696 = vrot.lane.b32.xlu1 %v692_v14, %s1583_s26 }
  0x91   :  { %694 = vrot.lane.b32.xlu0 %v693_v21, %s1583_s26  ;;  %v749_v21 = vsel %vm240_vm1, %v747_v38, %v748_v34 }
  0x92   :  { %v128_v35 = vpop.permute.xlu1 %127 }
  0x93   :  { %v126_v48 = vpop.permute.xlu0 %125 }
  0x94   :  { %v131_v14 = vadd.f32 %v126_v48, %v105_v26  ;;  %712 = vrot.lane.b32.xlu1 %v708_v36, %s1583_s26  ;;  %v775_v48 = vmul.f32 %v1965_v54, %v2061_v41 }
  0x95   :  { %710 = vrot.lane.b32.xlu0 %v709_v58, %s1583_s26  ;;  %v86_v58 = vmul.f32 %v2014_v10, %v1612_v2 }
  0x96   :  { %v141_v61 = vpop.permute.xlu1 %140  ;;  %v157_v45 = vadd.f32 %v1754_v20, %v131_v14  ;;  %v792_v20 = vmul.f32 %v1957_v44, %v2066_v31  ;;  %v779_v53 = vrot.slane %v775_v48, 2 }
  0x97   :  { %v139_v13 = vpop.permute.xlu0 %138  ;;  %v88_v14 = vadd.f32 %v86_v58, %v2026_v11 }
  0x98   :  { %v144_v36 = vadd.f32 %v139_v13, %v118_v23  ;;  %752 = vrot.lane.b32.xlu1 %v748_v34, %s1582_s23  ;;  %v791_v23 = vmul.f32 %v1965_v54, %v2066_v31  ;;  %v91_v34 = vmul.f32 %v2023_v47, %v1612_v2  ;;  %v781_v49 = vsel %vm240_vm1, %v779_v53, %v780_v37  ;;  %v2095_v2 = vld [vmem:[%s2692_s0 + $0x38] sm:$0xff] }
  0x99   :  { %750 = vrot.lane.b32.xlu0 %v749_v21, %s1582_s23  ;;  %v796_v13 = vrot.slane %v792_v20, 2  ;;  %v2101_v20 = vld [vmem:[%s2692_s0 + $0x30] sm:$0xff] }
  0x9a   :  { %v182_v38 = vpop.permute.xlu1 %181  ;;  %v169_v56 = vadd.f32 %v1768_v27, %v144_v36  ;;  %v795_v27 = vrot.slane %v791_v23, 2  ;;  %v93_v48 = vadd.f32 %v91_v34, %v2051_v0  ;;  %v106_v36 = vadd.f32 %v102_v29, %v88_v14 }
  0x9b   :  { %v180_v26 = vpop.permute.xlu0 %179  ;;  %v825_v29 = vmul.f32 %v2095_v2, %v1616_v4 }
  0x9c   :  { %768 = vrot.lane.b32.xlu1 %v764_v16, %s1582_s23  ;;  %v185_v16 = vadd.f32 %v180_v26, %v157_v45  ;;  %v119_v34 = vadd.f32 %v2046_v5, %v93_v48  ;;  %v824_v45 = vmul.f32 %v2101_v20, %v1616_v4  ;;  %v837_v5 = vmul.f32 %v2095_v2, %v1607_v1 }
  0x9d   :  { %766 = vrot.lane.b32.xlu0 %v765_v59, %s1582_s23  ;;  %v797_v59 = vsel %vm240_vm1, %v795_v27, %v796_v13  ;;  %v2784_v27 = vrot.slane %v1724_v3, 1  ;;  %v836_v4 = vmul.f32 %v2101_v20, %v1607_v1  ;;  %v2785_v3 = vrot.slane %v1747_v18, 1 }
  0x9e   :  { %v198_v21 = vpop.permute.xlu1 %197  ;;  %v848_v1 = vmul.f32 %v2101_v20, %v1626_v8  ;;  %v894_v18 = vmul.f32 %v2101_v20, %v1628_v9 }
  0x9f   :  { %v196_v60 = vpop.permute.xlu0 %195 }
  0xa0   :  { %784 = vrot.lane.b32.xlu1 %v780_v37, %s1583_s26  ;;  %v132_v37 = vadd.f32 %v128_v35, %v106_v36  ;;  %v201_v26 = vadd.f32 %v196_v60, %v169_v56  ;;  %v145_v35 = vadd.f32 %v141_v61, %v119_v34 }
  0xa1   :  { %782 = vrot.lane.b32.xlu0 %v781_v49, %s1583_s26 }
  0xa2   :  { %v214_v58 = vpop.permute.xlu1 %213  ;;  %v158_v36 = vadd.f32 %v2784_v27, %v132_v37  ;;  %v170_v56 = vadd.f32 %v2785_v3, %v145_v35  ;;  %v849_v37 = vmul.f32 %v2095_v2, %v1626_v8  ;;  %v910_v8 = vmul.f32 %v2095_v2, %v1642_v15 }
  0xa3   :  { %v212_v53 = vpop.permute.xlu0 %211 }
  0xa4   :  { %v217_v23 = vadd.f32 %v212_v53, %v185_v16  ;;  %800 = vrot.lane.b32.xlu1 %v796_v13, %s1583_s26  ;;  %v186_v48 = vadd.f32 %v182_v38, %v158_v36  ;;  %v202_v38 = vadd.f32 %v198_v21, %v170_v56  ;;  %v861_v21 = vmul.f32 %v2095_v2, %v1636_v12 }
  0xa5   :  { %798 = vrot.lane.b32.xlu0 %v797_v59, %s1583_s26 }
  0xa6   :  { %v230_v14 = vpop.permute.xlu1 %229  ;;  %v246_v49 = vadd.f32 %v1806_v46, %v217_v23  ;;  %v218_v60 = vadd.f32 %v214_v58, %v186_v48  ;;  %v2132_v58 = vstv %s1501_s24 }
  0xa7   :  { %v228_v13 = vpop.permute.xlu0 %227  ;;  %v234_v23 = vadd.f32 %v230_v14, %v202_v38  ;;  %v2148_v14 = vstv %s1528_s25 }
  0xa8   :  { %v233_v16 = vadd.f32 %v228_v13, %v201_v26  ;;  %830 = vrot.lane.b32.xlu1 %v825_v29, %s1582_s23  ;;  %v2786_v29 = vrot.slane %v1778_v32, 2  ;;  %v909_v26 = vmul.f32 %v2101_v20, %v1642_v15  ;;  %v329_v32 = vmul.f32 %v1718_v62, %v2132_v58 }
  0xa9   :  { %828 = vrot.lane.b32.xlu0 %v824_v45, %s1582_s23  ;;  %v2787_v15 = vrot.slane %v1792_v39, 2  ;;  %v925_v39 = vmul.f32 %v2095_v2, %v1654_v22 }
  0xaa   :  { %v271_v46 = vpop.permute.xlu1 %270  ;;  %v258_v61 = vadd.f32 %v1820_v55, %v233_v16  ;;  %v895_v55 = vmul.f32 %v2095_v2, %v1628_v9  ;;  %v247_v34 = vadd.f32 %v2786_v29, %v218_v60  ;;  %v860_v9 = vmul.f32 %v2101_v20, %v1636_v12 }
  0xab   :  { %v269_v59 = vpop.permute.xlu0 %268  ;;  %v898_v16 = vrot.slane %v894_v18, 1  ;;  %v259_v48 = vadd.f32 %v2787_v15, %v234_v23  ;;  %v914_v12 = vrot.slane %v910_v8, 1  ;;  %v913_v56 = vrot.slane %v909_v26, 1 }
  0xac   :  { %842 = vrot.lane.b32.xlu1 %v837_v5, %s1582_s23  ;;  %v275_v35 = vadd.f32 %v271_v46, %v247_v34  ;;  %v274_v27 = vadd.f32 %v269_v59, %v246_v49  ;;  %v899_v13 = vrot.slane %v895_v55, 1  ;;  %v328_v5 = vmul.f32 %v1730_v6, %v2132_v58 }
  0xad   :  { %840 = vrot.lane.b32.xlu0 %v836_v4, %s1582_s23  ;;  %v334_v60 = vmul.f32 %v1718_v62, %v2148_v14  ;;  %v924_v23 = vmul.f32 %v2101_v20, %v1654_v22  ;;  %v929_v26 = vrot.slane %v925_v39, 1  ;;  %v2788_v39 = vrot.slane %v1846_v19, 1 }
  0xae   :  { %v287_v53 = vpop.permute.xlu1 %286  ;;  %v900_v55 = vsel %vm151_vm0, %v898_v16, %v899_v13 }
  0xaf   :  { %v285_v45 = vpop.permute.xlu0 %284  ;;  %v291_v49 = vadd.f32 %v287_v53, %v259_v48  ;;  %v928_v22 = vrot.slane %v924_v23, 1 }
  0xb0   :  { %854 = vrot.lane.b32.xlu1 %v849_v37, %s1583_s26  ;;  %v333_v37 = vmul.f32 %v1730_v6, %v2148_v14  ;;  %v290_v38 = vadd.f32 %v285_v45, %v258_v61  ;;  %v940_v6 = vmul.f32 %v2095_v2, %v1663_v28  ;;  %v939_v61 = vmul.f32 %v2101_v20, %v1663_v28 }
  0xb1   :  { %852 = vrot.lane.b32.xlu0 %v848_v1, %s1583_s26  ;;  %v930_v28 = vsel %vm151_vm0, %v928_v22, %v929_v26  ;;  %v1021_v22 = vmul.f32 %v2101_v20, %v1699_v52 }
  0xb2   :  { %v303_v36 = vpop.permute.xlu1 %302 }
  0xb3   :  { %v307_v4 = vadd.f32 %v303_v36, %v275_v35  ;;  %v301_v46 = vpop.permute.xlu0 %300  ;;  %v944_v36 = vrot.slane %v940_v6, 1 }
  0xb4   :  { %v306_v3 = vadd.f32 %v301_v46, %v274_v27  ;;  %866 = vrot.lane.b32.xlu1 %v861_v21, %s1583_s26  ;;  %v915_v21 = vsel %vm151_vm0, %v913_v56, %v914_v12 }
  0xb5   :  { %864 = vrot.lane.b32.xlu0 %v860_v9, %s1583_s26  ;;  %v331_v59 = vadd.f32 %v329_v32, %v307_v4  ;;  %v977_v9 = vmul.f32 %v2095_v2, %v1667_v30  ;;  %v976_v32 = vmul.f32 %v2101_v20, %v1667_v30  ;;  %v992_v4 = vmul.f32 %v2095_v2, %v1681_v40 }
  0xb6   :  { %v319_v1 = vpop.permute.xlu1 %318  ;;  %v330_v18 = vadd.f32 %v328_v5, %v306_v3  ;;  %v991_v30 = vmul.f32 %v2101_v20, %v1681_v40 }
  0xb7   :  { %v323_v29 = vadd.f32 %v319_v1, %v291_v49  ;;  %v317_v62 = vpop.permute.xlu0 %316  ;;  %v981_v5 = vrot.slane %v977_v9, 2  ;;  %v980_v15 = vrot.slane %v976_v32, 2  ;;  %v996_v1 = vrot.slane %v992_v4, 2 }
  0xb8   :  { %v322_v53 = vadd.f32 %v317_v62, %v290_v38  ;;  %903 = vrot.lane.b32.xlu1 %v899_v13, %s1582_s23  ;;  %v943_v13 = vrot.slane %v939_v61, 1  ;;  %v1006_v62 = vmul.f32 %v2101_v20, %v1685_v42  ;;  %v2789_v61 = vrot.slane %v1865_v43, 1 }
  0xb9   :  { %901 = vrot.lane.b32.xlu0 %v900_v55, %s1582_s23  ;;  %v336_v34 = vadd.f32 %v334_v60, %v323_v29  ;;  %v995_v55 = vrot.slane %v991_v30, 2  ;;  %v1007_v29 = vmul.f32 %v2095_v2, %v1685_v42 }
  0xba   :  { %v345_v45 = vpop.permute.xlu1 %344  ;;  %v335_v8 = vadd.f32 %v333_v37, %v322_v53  ;;  %v982_v37 = vsel %vm240_vm1, %v980_v15, %v981_v5  ;;  %v1010_v42 = vrot.slane %v1006_v62, 2 }
  0xbb   :  { %v343_v35 = vpop.permute.xlu0 %342  ;;  %v349_v48 = vadd.f32 %v345_v45, %v331_v59  ;;  %v997_v19 = vsel %vm240_vm1, %v995_v55, %v996_v1 }
  0xbc   :  { %918 = vrot.lane.b32.xlu1 %v914_v12, %s1582_s23  ;;  %v348_v46 = vadd.f32 %v343_v35, %v330_v18  ;;  %v945_v12 = vsel %vm151_vm0, %v943_v13, %v944_v36 }
  0xbd   :  { %916 = vrot.lane.b32.xlu0 %v915_v21, %s1582_s23 }
  0xbe   :  { %v358_v27 = vpop.permute.xlu1 %357 }
  0xbf   :  { %v356_v16 = vpop.permute.xlu0 %355  ;;  %v362_v59 = vadd.f32 %v358_v27, %v336_v34  ;;  %v1025_v27 = vrot.slane %v1021_v22, 2 }
  0xc0   :  { %933 = vrot.lane.b32.xlu1 %v929_v26, %s1583_s26  ;;  %v361_v40 = vadd.f32 %v356_v16, %v335_v8  ;;  %v1011_v26 = vrot.slane %v1007_v29, 2  ;;  %v2792_v29 = vld [vmem:[#allocation8_spill] sm:$0xff] }
  0xc1   :  { %931 = vrot.lane.b32.xlu0 %v930_v28, %s1583_s26 }
  0xc2   :  { %v371_v3 = vpop.permute.xlu1 %370  ;;  %v1012_v43 = vsel %vm240_vm1, %v1010_v42, %v1011_v26  ;;  %v2795_v42 = vld [vmem:[#allocation12_spill] sm:$0xff] }
  0xc3   :  { %v375_v56 = vadd.f32 %v371_v3, %v349_v48  ;;  %v369_v60 = vpop.permute.xlu0 %368 }
  0xc4   :  { %v374_v49 = vadd.f32 %v369_v60, %v348_v46  ;;  %948 = vrot.lane.b32.xlu1 %v944_v36, %s1583_s26 }
  0xc5   :  { %946 = vrot.lane.b32.xlu0 %v945_v12, %s1583_s26  ;;  %v400_v38 = vadd.f32 %v2788_v39, %v375_v56  ;;  %v2790_v12 = vrot.slane %v1898_v24, 2  ;;  %v2791_v24 = vrot.slane %v1909_v50, 2 }
  0xc6   :  { %v384_v18 = vpop.permute.xlu1 %383  ;;  %v399_v23 = vadd.f32 %v1873_v51, %v374_v49  ;;  %v1022_v51 = vmul.f32 %v2095_v2, %v1699_v52  ;;  %v2214_v52 = vld [vmem:[%s2692_s0 + $0x48] sm:$0xff] }
  0xc7   :  { %v388_v53 = vadd.f32 %v384_v18, %v362_v59  ;;  %v382_v6 = vpop.permute.xlu0 %381  ;;  %v1048_v30 = vmul.f32 %v2214_v52, %v1720_v63  ;;  %v1118_v62 = vmul.f32 %v2214_v52, %v2792_v29  ;;  %v1148_v22 = vmul.f32 %v2214_v52, %v2795_v42 }
  0xc8   :  { %v387_v34 = vadd.f32 %v382_v6, %v361_v40  ;;  %985 = vrot.lane.b32.xlu1 %v981_v5, %s1582_s23  ;;  %v1026_v32 = vrot.slane %v1022_v51, 2  ;;  %v2220_v5 = vld [vmem:[%s2692_s0 + $0x40] sm:$0xff]  ;;  %v2793_v6 = vld [vmem:[#allocation10_spill] sm:$0xff]  ;;  %v2794_v51 = vld [vmem:[#allocation11_spill] sm:$0xff] }
  0xc9   :  { %983 = vrot.lane.b32.xlu0 %v982_v37, %s1582_s23  ;;  %v412_v45 = vadd.f32 %v2789_v61, %v388_v53  ;;  %v1047_v3 = vmul.f32 %v2220_v5, %v1720_v63  ;;  %v1059_v63 = vmul.f32 %v2220_v5, %v1743_v17  ;;  %v1122_v61 = vrot.slane %v1118_v62, 1 }
  0xca   :  { %v424_v21 = vpop.permute.xlu1 %423  ;;  %v411_v8 = vadd.f32 %v1887_v7, %v387_v34  ;;  %v1027_v16 = vsel %vm240_vm1, %v1025_v27, %v1026_v32  ;;  %v1084_v34 = vmul.f32 %v2214_v52, %v2793_v6 }
  0xcb   :  { %v422_v35 = vpop.permute.xlu0 %421  ;;  %v428_v36 = vadd.f32 %v424_v21, %v400_v38  ;;  %v1133_v21 = vmul.f32 %v2214_v52, %v2794_v51 }
  0xcc   :  { %1000 = vrot.lane.b32.xlu1 %v996_v1, %s1582_s23  ;;  %v427_v7 = vadd.f32 %v422_v35, %v399_v23  ;;  %v1060_v1 = vmul.f32 %v2214_v52, %v1743_v17  ;;  %v1072_v23 = vmul.f32 %v2214_v52, %v1760_v25  ;;  %v1071_v17 = vmul.f32 %v2220_v5, %v1760_v25 }
  0xcd   :  { %998 = vrot.lane.b32.xlu0 %v997_v19, %s1582_s23  ;;  %v1083_v25 = vmul.f32 %v2220_v5, %v2793_v6  ;;  %v1147_v35 = vmul.f32 %v2220_v5, %v2795_v42 }
  0xce   :  { %v440_v9 = vpop.permute.xlu1 %439 }
  0xcf   :  { %v438_v28 = vpop.permute.xlu0 %437  ;;  %v444_v46 = vadd.f32 %v440_v9, %v412_v45 }
  0xd0   :  { %1015 = vrot.lane.b32.xlu1 %v1011_v26, %s1583_s26  ;;  %v443_v60 = vadd.f32 %v438_v28, %v411_v8  ;;  %v1132_v8 = vmul.f32 %v2220_v5, %v2794_v51 }
  0xd1   :  { %1013 = vrot.lane.b32.xlu0 %v1012_v43, %s1583_s26 }
  0xd2   :  { %v456_v13 = vpop.permute.xlu1 %455  ;;  %v1136_v27 = vrot.slane %v1132_v8, 1 }
  0xd3   :  { %v460_v15 = vadd.f32 %v456_v13, %v428_v36  ;;  %v454_v48 = vpop.permute.xlu0 %453  ;;  %v1152_v36 = vrot.slane %v1148_v22, 1  ;;  %v2341_v22 = vstv %s1510_s4 }
  0xd4   :  { %v459_v4 = vadd.f32 %v454_v48, %v427_v7  ;;  %1030 = vrot.lane.b32.xlu1 %v1026_v32, %s1583_s26  ;;  %v1137_v32 = vrot.slane %v1133_v21, 1  ;;  %v1151_v7 = vrot.slane %v1147_v35, 1  ;;  %v2333_v21 = vstv %s1513_s3 }
  0xd5   :  { %1028 = vrot.lane.b32.xlu0 %v1027_v16, %s1583_s26  ;;  %v2230_v56 = vadd.f32 %v2790_v12, %v460_v15  ;;  %v2796_v15 = vld [vmem:[#allocation13_spill] sm:$0xff]  ;;  %v2343_v35 = vstv %s1537_s5 }
  0xd6   :  { %v472_v49 = vpop.permute.xlu1 %471  ;;  %v2233_v37 = vadd.f32 %v1922_v33, %v459_v4  ;;  %v1138_v16 = vsel %vm151_vm0, %v1136_v27, %v1137_v32  ;;  %v1163_v48 = vmul.f32 %v2214_v52, %v2796_v15  ;;  %v1162_v4 = vmul.f32 %v2220_v5, %v2796_v15 }
  0xd7   :  { %v476_v59 = vadd.f32 %v472_v49, %v444_v46  ;;  %v470_v39 = vpop.permute.xlu0 %469  ;;  %v1153_v46 = vsel %vm151_vm0, %v1151_v7, %v1152_v36  ;;  %v2797_v49 = vld [vmem:[#allocation16_spill] sm:$0xff] }
  0xd8   :  { %v475_v38 = vadd.f32 %v470_v39, %v443_v60  ;;  %1053 = vrot.lane.b32.xlu1 %v1048_v30, %s1582_s23  ;;  %v1167_v12 = vrot.slane %v1163_v48, 1  ;;  %v1166_v60 = vrot.slane %v1162_v4, 1  ;;  %v1199_v39 = vmul.f32 %v2220_v5, %v2797_v49  ;;  %v2800_v48 = vld [vmem:[#allocation21_spill] sm:$0xff] }
  0xd9   :  { %1051 = vrot.lane.b32.xlu0 %v1047_v3, %s1582_s23  ;;  %v2243_v55 = vadd.f32 %v2791_v24, %v476_v59  ;;  %v1200_v59 = vmul.f32 %v2214_v52, %v2797_v49  ;;  %v1245_v4 = vmul.f32 %v2214_v52, %v2800_v48  ;;  %v575_v49 = vmul.f32 %v1957_v44, %v2343_v35 }
  0xda   :  { %v2245_v40 = vpop.permute.xlu1 %511  ;;  %v2248_v33 = vadd.f32 %v1932_v57, %v475_v38  ;;  %v1117_v57 = vmul.f32 %v2220_v5, %v2792_v29  ;;  %v1203_v62 = vrot.slane %v1199_v39, 2  ;;  %v2382_v39 = vstv %s2326_s6 }
  0xdb   :  { %v2250_v18 = vpop.permute.xlu0 %509  ;;  %v1204_v29 = vrot.slane %v1200_v59, 2 }
  0xdc   :  { %1065 = vrot.lane.b32.xlu1 %v1060_v1, %s1582_s23  ;;  %v1121_v45 = vrot.slane %v1117_v57, 1  ;;  %v2798_v1 = vld [vmem:[#allocation18_spill] sm:$0xff]  ;;  %v515_v7 = vadd.f32 %v2250_v18, %v2233_v37  ;;  %v569_v18 = vmul.f32 %v1965_v54, %v2341_v22 }
  0xdd   :  { %1063 = vrot.lane.b32.xlu0 %v1059_v63, %s1582_s23  ;;  %v1215_v63 = vmul.f32 %v2214_v52, %v2798_v1  ;;  %v1214_v24 = vmul.f32 %v2220_v5, %v2798_v1  ;;  %v1205_v51 = vsel %vm240_vm1, %v1203_v62, %v1204_v29 }
  0xde   :  { %v2258_v50 = vpop.permute.xlu1 %527  ;;  %v1123_v43 = vsel %vm151_vm0, %v1121_v45, %v1122_v61 }
  0xdf   :  { %v2264_v53 = vpop.permute.xlu0 %525  ;;  %v1219_v6 = vrot.slane %v1215_v63, 2 }
  0xe0   :  { %1077 = vrot.lane.b32.xlu1 %v1072_v23, %s1583_s26 }
  0xe1   :  { %1075 = vrot.lane.b32.xlu0 %v1071_v17, %s1583_s26  ;;  %v1168_v17 = vsel %vm151_vm0, %v1166_v60, %v1167_v12 }
  0xe2   :  { %v2272_v19 = vpop.permute.xlu1 %543 }
  0xe3   :  { %v2278_v26 = vpop.permute.xlu0 %541 }
  0xe4   :  { %1089 = vrot.lane.b32.xlu1 %v1084_v34, %s1583_s26  ;;  %v1218_v34 = vrot.slane %v1214_v24, 2  ;;  %v547_v37 = vadd.f32 %v2278_v26, %v515_v7  ;;  %v531_v26 = vadd.f32 %v2264_v53, %v2248_v33  ;;  %v1249_v24 = vrot.slane %v1245_v4, 2 }
  0xe5   :  { %1087 = vrot.lane.b32.xlu0 %v1083_v25, %s1583_s26  ;;  %v2799_v25 = vld [vmem:[#allocation20_spill] sm:$0xff]  ;;  %v574_v33 = vmul.f32 %v1965_v54, %v2343_v35 }
  0xe6   :  { %v2286_v9 = vpop.permute.xlu1 %559  ;;  %v1229_v8 = vmul.f32 %v2220_v5, %v2799_v25  ;;  %v1220_v27 = vsel %vm240_vm1, %v1218_v34, %v1219_v6 }
  0xe7   :  { %v2289_v28 = vpop.permute.xlu0 %557 }
  0xe8   :  { %1126 = vrot.lane.b32.xlu1 %v1122_v61, %s1582_s23  ;;  %v1230_v61 = vmul.f32 %v2214_v52, %v2799_v25  ;;  %v1233_v15 = vrot.slane %v1229_v8, 2  ;;  %v563_v34 = vadd.f32 %v2289_v28, %v531_v26  ;;  %v571_v25 = vadd.f32 %v569_v18, %v547_v37  ;;  %v2408_v28 = vld [vmem:[%s2692_s0 + $0x58] sm:$0xff] }
  0xe9   :  { %1124 = vrot.lane.b32.xlu0 %v1123_v43, %s1582_s23  ;;  %v516_v43 = vadd.f32 %v2245_v40, %v2230_v56  ;;  %v1244_v56 = vmul.f32 %v2220_v5, %v2800_v48 }
  0xea   :  { %v2293_v13 = vpop.permute.xlu1 %585  ;;  %v576_v48 = vadd.f32 %v574_v33, %v563_v34  ;;  %v2802_v34 = vld [vmem:[#allocation23_spill] sm:$0xff] }
  0xeb   :  { %v2300_v30 = vpop.permute.xlu0 %583  ;;  %v548_v40 = vadd.f32 %v2272_v19, %v516_v43  ;;  %v532_v19 = vadd.f32 %v2258_v50, %v2243_v55 }
  0xec   :  { %1141 = vrot.lane.b32.xlu1 %v1137_v32, %s1582_s23  ;;  %v2351_v32 = vmul.f32 %v1957_v44, %v2333_v21 }
  0xed   :  { %1139 = vrot.lane.b32.xlu0 %v1138_v16, %s1582_s23  ;;  %v564_v55 = vadd.f32 %v2286_v9, %v532_v19  ;;  %v643_v9 = vmul.f32 %v1965_v54, %v2382_v39 }
  0xee   :  { %v2305_v3 = vpop.permute.xlu1 %598  ;;  %v636_v59 = vrot.slane %v2351_v32, 1 }
  0xef   :  { %v2311_v38 = vpop.permute.xlu0 %596 }
  0xf0   :  { %1156 = vrot.lane.b32.xlu1 %v1152_v36, %s1583_s26  ;;  %v1234_v36 = vrot.slane %v1230_v61, 2  ;;  %v644_v61 = vmul.f32 %v1957_v44, %v2382_v39  ;;  %v602_v19 = vadd.f32 %v2311_v38, %v576_v48  ;;  %v1283_v38 = vmul.f32 %v2408_v28, %v2802_v34 }
  0xf1   :  { %1154 = vrot.lane.b32.xlu0 %v1153_v46, %s1583_s26  ;;  %v570_v46 = vmul.f32 %v1957_v44, %v2341_v22 }
  0xf2   :  { %v2319_v23 = vpop.permute.xlu1 %611  ;;  %v1235_v63 = vsel %vm240_vm1, %v1233_v15, %v1234_v36  ;;  %v648_v37 = vrot.slane %v644_v61, 1 }
  0xf3   :  { %v2322_v57 = vpop.permute.xlu0 %609  ;;  %v572_v50 = vadd.f32 %v570_v46, %v548_v40  ;;  %v2428_v46 = vstv %s2373_s8 }
  0xf4   :  { %1171 = vrot.lane.b32.xlu1 %v1167_v12, %s1583_s26  ;;  %v631_v12 = vmul.f32 %v1965_v54, %v2333_v21 }
  0xf5   :  { %1169 = vrot.lane.b32.xlu0 %v1168_v17, %s1583_s26  ;;  %v1248_v17 = vrot.slane %v1244_v56, 2  ;;  %v590_v53 = vadd.f32 %v2293_v13, %v572_v50  ;;  %v2415_v13 = vld [vmem:[%s2692_s0 + $0x50] sm:$0xff]  ;;  %v2801_v56 = vld [vmem:[#allocation22_spill] sm:$0xff] }
  0xf6   :  { %v2330_v45 = vpop.permute.xlu1 %624  ;;  %v1271_v40 = vmul.f32 %v2408_v28, %v2801_v56  ;;  %v1270_v18 = vmul.f32 %v2415_v13, %v2801_v56 }
  0xf7   :  { %v2337_v42 = vpop.permute.xlu0 %622  ;;  %v1250_v43 = vsel %vm240_vm1, %v1248_v17, %v1249_v24  ;;  %v732_v17 = vmul.f32 %v1957_v44, %v2428_v46 }
  0xf8   :  { %1208 = vrot.lane.b32.xlu1 %v1204_v29, %s1582_s23  ;;  %v635_v29 = vrot.slane %v631_v12, 1 }
  0xf9   :  { %1206 = vrot.lane.b32.xlu0 %v1205_v51, %s1582_s23  ;;  %v589_v51 = vadd.f32 %v2300_v30, %v571_v25  ;;  %v736_v61 = vrot.slane %v732_v17, 2 }
  0xfa   :  { %v2356_v16 = vpop.permute.xlu1 %664  ;;  %v637_v7 = vsel %vm151_vm0, %v635_v29, %v636_v59 }
  0xfb   :  { %v2367_v60 = vpop.permute.xlu0 %662  ;;  %v615_v4 = vadd.f32 %v2322_v57, %v589_v51 }
  0xfc   :  { %1223 = vrot.lane.b32.xlu1 %v1219_v6, %s1582_s23  ;;  %v2393_v6 = vstv %s2339_s7 }
  0xfd   :  { %1221 = vrot.lane.b32.xlu0 %v1220_v27, %s1582_s23  ;;  %v720_v32 = vmul.f32 %v1957_v44, %v2393_v6  ;;  %v577_v27 = vadd.f32 %v575_v49, %v564_v55  ;;  %v719_v30 = vmul.f32 %v1965_v54, %v2393_v6  ;;  %v628_v55 = vadd.f32 %v2337_v42, %v602_v19 }
  0xfe   :  { %v2386_v1 = vpop.permute.xlu1 %680  ;;  %v640_v50 = vadd.f32 %v637_v7, %v615_v4  ;;  %v1282_v44 = vmul.f32 %v2415_v13, %v2802_v34 }
  0xff   :  { %v2390_v62 = vpop.permute.xlu0 %678  ;;  %v603_v12 = vadd.f32 %v2305_v3, %v577_v27  ;;  %v724_v57 = vrot.slane %v720_v32, 2  ;;  %v731_v3 = vmul.f32 %v1965_v54, %v2428_v46  ;;  %v723_v29 = vrot.slane %v719_v30, 2 }
 0x100   :  { %1238 = vrot.lane.b32.xlu1 %v1234_v36, %s1583_s26  ;;  %v616_v36 = vadd.f32 %v2319_v23, %v590_v53  ;;  %v647_v23 = vrot.slane %v643_v9, 1  ;;  %v668_v54 = vadd.f32 %v2367_v60, %v640_v50 }
 0x101   :  { %1236 = vrot.lane.b32.xlu0 %v1235_v63, %s1583_s26  ;;  %v629_v26 = vadd.f32 %v2330_v45, %v603_v12  ;;  %v735_v9 = vrot.slane %v731_v3, 2  ;;  %v725_v32 = vsel %vm240_vm1, %v723_v29, %v724_v57 }
 0x102   :  { %v697_v8 = vpop.permute.xlu1 %696  ;;  %v641_v63 = vadd.f32 %v636_v59, %v616_v36  ;;  %v649_v45 = vsel %vm151_vm0, %v647_v23, %v648_v37  ;;  %v2805_v23 = vld [vmem:[#allocation26_spill] sm:$0xff] }
 0x103   :  { %v695_v15 = vpop.permute.xlu0 %694  ;;  %v653_v42 = vadd.f32 %v648_v37, %v629_v26  ;;  %v652_v51 = vadd.f32 %v649_v45, %v628_v55  ;;  %v1306_v19 = vmul.f32 %v2415_v13, %v2805_v23 }
 0x104   :  { %1253 = vrot.lane.b32.xlu1 %v1249_v24, %s1583_s26  ;;  %v669_v25 = vadd.f32 %v2356_v16, %v641_v63  ;;  %v2803_v16 = vld [vmem:[#allocation24_spill] sm:$0xff] }
 0x105   :  { %1251 = vrot.lane.b32.xlu0 %v1250_v43, %s1583_s26  ;;  %v700_v43 = vadd.f32 %v695_v15, %v668_v54  ;;  %v1295_v27 = vmul.f32 %v2408_v28, %v2803_v16  ;;  %v685_v36 = vadd.f32 %v2386_v1, %v653_v42  ;;  %v1294_v60 = vmul.f32 %v2415_v13, %v2803_v16  ;;  %v2808_v16 = vld [vmem:[#allocation29_spill] sm:$0xff] }
 0x106   :  { %v713_v49 = vpop.permute.xlu1 %712  ;;  %v701_v33 = vadd.f32 %v697_v8, %v669_v25  ;;  %v2804_v8 = vld [vmem:[#allocation25_spill] sm:$0xff]  ;;  %v684_v30 = vadd.f32 %v2390_v62, %v652_v51 }
 0x107   :  { %v711_v24 = vpop.permute.xlu0 %710  ;;  %v1341_v7 = vmul.f32 %v2408_v28, %v2804_v8  ;;  %v1340_v15 = vmul.f32 %v2415_v13, %v2804_v8  ;;  %v717_v4 = vadd.f32 %v713_v49, %v685_v36  ;;  %v728_v37 = vadd.f32 %v725_v32, %v700_v43  ;;  %v2806_v49 = vld [vmem:[#allocation27_spill] sm:$0xff] }
 0x108   :  { %1276 = vrot.lane.b32.xlu1 %v1271_v40, %s1582_s23  ;;  %v729_v56 = vadd.f32 %v724_v57, %v701_v33  ;;  %v737_v40 = vsel %vm240_vm1, %v735_v9, %v736_v61  ;;  %v716_v1 = vadd.f32 %v711_v24, %v684_v30  ;;  %v1356_v57 = vmul.f32 %v2408_v28, %v2806_v49  ;;  %v2807_v33 = vld [vmem:[#allocation28_spill] sm:$0xff] }
 0x109   :  { %1274 = vrot.lane.b32.xlu0 %v1270_v18, %s1582_s23  ;;  %v1307_v18 = vmul.f32 %v2408_v28, %v2805_v23  ;;  %v1345_v62 = vrot.slane %v1341_v7, 1  ;;  %v1344_v63 = vrot.slane %v1340_v15, 1  ;;  %v1355_v3 = vmul.f32 %v2415_v13, %v2806_v49  ;;  %v2810_v23 = vld [vmem:[#allocation5_spill] sm:$0xff] }
 0x10a   :  { %v753_v59 = vpop.permute.xlu1 %752  ;;  %v741_v55 = vadd.f32 %v736_v61, %v717_v4  ;;  %v740_v34 = vadd.f32 %v737_v40, %v716_v1  ;;  %v1370_v61 = vmul.f32 %v2415_v13, %v2807_v33  ;;  %v817_v32 = vmul.f32 %v2095_v2, %v2014_v10 }
 0x10b   :  { %v751_v53 = vpop.permute.xlu0 %750  ;;  %v757_v26 = vadd.f32 %v753_v59, %v729_v56  ;;  %v1346_v45 = vsel %vm151_vm0, %v1344_v63, %v1345_v62  ;;  %v1359_v42 = vrot.slane %v1355_v3, 1  ;;  %v1385_v36 = vmul.f32 %v2415_v13, %v2808_v16 }
 0x10c   :  { %1288 = vrot.lane.b32.xlu1 %v1283_v38, %s1582_s23  ;;  %v756_v17 = vadd.f32 %v751_v53, %v728_v37  ;;  %v1371_v53 = vmul.f32 %v2408_v28, %v2807_v33  ;;  %v816_v8 = vmul.f32 %v2101_v20, %v2014_v10  ;;  %v1374_v30 = vrot.slane %v1370_v61, 1  ;;  %v2809_v10 = vld [vmem:[#allocation30_spill] sm:$0xff] }
 0x10d   :  { %1286 = vrot.lane.b32.xlu0 %v1282_v44, %s1582_s23  ;;  %v1360_v44 = vrot.slane %v1356_v57, 1  ;;  %v819_v4 = vadd.f32 %v817_v32, %v2026_v11  ;;  %v821_v56 = vmul.f32 %v2095_v2, %v2023_v47  ;;  %v820_v40 = vmul.f32 %v2101_v20, %v2023_v47 }
 0x10e   :  { %v769_v48 = vpop.permute.xlu1 %768  ;;  %v1375_v15 = vrot.slane %v1371_v53, 1  ;;  %v1389_v1 = vrot.slane %v1385_v36, 1  ;;  %v1423_v37 = vmul.f32 %v2408_v28, %v2809_v10  ;;  %v1422_v63 = vmul.f32 %v2415_v13, %v2809_v10 }
 0x10f   :  { %v767_v12 = vpop.permute.xlu0 %766  ;;  %v773_v25 = vadd.f32 %v769_v48, %v741_v55  ;;  %v1361_v7 = vsel %vm151_vm0, %v1359_v42, %v1360_v44  ;;  %v872_v47 = vmul.f32 %v2101_v20, %v2810_v23  ;;  %v823_v57 = vadd.f32 %v821_v56, %v2051_v0 }
 0x110   :  { %1300 = vrot.lane.b32.xlu1 %v1295_v27, %s1583_s26  ;;  %v772_v54 = vadd.f32 %v767_v12, %v740_v34  ;;  %v1386_v27 = vmul.f32 %v2408_v28, %v2808_v16  ;;  %v1427_v3 = vrot.slane %v1423_v37, 2  ;;  %v1426_v34 = vrot.slane %v1422_v63, 2 }
 0x111   :  { %1298 = vrot.lane.b32.xlu0 %v1294_v60, %s1583_s26  ;;  %v1468_v10 = vmul.f32 %v2408_v28, %v2066_v31  ;;  %v1467_v37 = vmul.f32 %v2415_v13, %v2066_v31 }
 0x112   :  { %v785_v24 = vpop.permute.xlu1 %784  ;;  %v1390_v12 = vrot.slane %v1386_v27, 1  ;;  %v1428_v16 = vsel %vm240_vm1, %v1426_v34, %v1427_v3 }
 0x113   :  { %v789_v50 = vadd.f32 %v785_v24, %v757_v26  ;;  %v783_v29 = vpop.permute.xlu0 %782 }
 0x114   :  { %v788_v38 = vadd.f32 %v783_v29, %v756_v17  ;;  %1312 = vrot.lane.b32.xlu1 %v1307_v18, %s1583_s26  ;;  %v873_v18 = vmul.f32 %v2095_v2, %v2810_v23  ;;  %v822_v17 = vadd.f32 %v820_v40, %v2051_v0 }
 0x115   :  { %809 = vst.msk [vmem:[%s2694_s2 + $0x8] sm:$0x3f] %vm808_vm2, %v789_v50  ;;  %1310 = vrot.lane.b32.xlu0 %v1306_v19, %s1583_s26  ;;  %v818_v19 = vadd.f32 %v816_v8, %v2026_v11  ;;  %v1391_v11 = vsel %vm151_vm0, %v1389_v1, %v1390_v12 }
 0x116   :  { %807 = vst.msk [vmem:[%s2694_s2] sm:$0xff] %vm806_vm3, %v788_v38  ;;  %v801_v59 = vpop.permute.xlu1 %800  ;;  %v877_v55 = vrot.slane %v873_v18, 1  ;;  %v2811_v38 = vld [vmem:[#allocation31_spill] sm:$0xff] }
 0x117   :  { %v805_v9 = vadd.f32 %v801_v59, %v773_v25  ;;  %v799_v51 = vpop.permute.xlu0 %798  ;;  %v1438_v25 = vmul.f32 %v2408_v28, %v2811_v38  ;;  %v2812_v59 = vld [vmem:[#allocation6_spill] sm:$0xff] }
 0x118   :  { %v804_v43 = vadd.f32 %v799_v51, %v772_v54  ;;  %1349 = vrot.lane.b32.xlu1 %v1345_v62, %s1582_s23  ;;  %v1376_v62 = vsel %vm151_vm0, %v1374_v30, %v1375_v15  ;;  %v876_v54 = vrot.slane %v872_v47, 1  ;;  %v884_v42 = vmul.f32 %v2095_v2, %v2812_v59 }
 0x119   :  { %1553 = vst.msk [vmem:[%s2694_s2 + $0x18] sm:$0x3f] %vm808_vm2, %v805_v9  ;;  %1347 = vrot.lane.b32.xlu0 %v1346_v45, %s1582_s23  ;;  %v1437_v45 = vmul.f32 %v2415_v13, %v2811_v38  ;;  %v883_v33 = vmul.f32 %v2101_v20, %v2812_v59  ;;  %v1453_v9 = vmul.f32 %v2408_v28, %v2061_v41  ;;  %v1442_v27 = vrot.slane %v1438_v25, 2 }
 0x11a   :  { %1552 = vst.msk [vmem:[%s2694_s2 + $0x10] sm:$0xff] %vm806_vm3, %v804_v43  ;;  %v831_v60 = vpop.permute.xlu1 %830  ;;  %v1452_v51 = vmul.f32 %v2415_v13, %v2061_v41 }
 0x11b   :  { %v829_v48 = vpop.permute.xlu0 %828  ;;  %v835_v24 = vadd.f32 %v831_v60, %v819_v4  ;;  %v1441_v36 = vrot.slane %v1437_v45, 2  ;;  %v887_v30 = vrot.slane %v883_v33, 1  ;;  %v1457_v56 = vrot.slane %v1453_v9, 2 }
 0x11c   :  { %1364 = vrot.lane.b32.xlu1 %v1360_v44, %s1582_s23  ;;  %v834_v50 = vadd.f32 %v829_v48, %v818_v19  ;;  %v1456_v41 = vrot.slane %v1452_v51, 2 }
 0x11d   :  { %1362 = vrot.lane.b32.xlu0 %v1361_v7, %s1582_s23  ;;  %v878_v7 = vsel %vm151_vm0, %v876_v54, %v877_v55  ;;  %v1443_v1 = vsel %vm240_vm1, %v1441_v36, %v1442_v27 }
 0x11e   :  { %v843_v26 = vpop.permute.xlu1 %842  ;;  %v1458_v63 = vsel %vm240_vm1, %v1456_v41, %v1457_v56 }
 0x11f   :  { %v841_v49 = vpop.permute.xlu0 %840  ;;  %v847_v61 = vadd.f32 %v843_v26, %v823_v57  ;;  %v1472_v57 = vrot.slane %v1468_v10, 2 }
 0x120   :  { %1379 = vrot.lane.b32.xlu1 %v1375_v15, %s1583_s26  ;;  %v846_v43 = vadd.f32 %v841_v49, %v822_v17  ;;  %v888_v15 = vrot.slane %v884_v42, 1  ;;  %v1471_v17 = vrot.slane %v1467_v37, 2 }
 0x121   :  { %1377 = vrot.lane.b32.xlu0 %v1376_v62, %s1583_s26 }
 0x122   :  { %v855_v29 = vpop.permute.xlu1 %854  ;;  %v889_v19 = vsel %vm151_vm0, %v887_v30, %v888_v15  ;;  %v1473_v34 = vsel %vm240_vm1, %v1471_v17, %v1472_v57 }
 0x123   :  { %v859_v44 = vadd.f32 %v855_v29, %v835_v24  ;;  %v853_v0 = vpop.permute.xlu0 %852  ;;  %v2813_v24 = vld [vmem:[#allocation7_spill] sm:$0xff] }
 0x124   :  { %v858_v53 = vadd.f32 %v853_v0, %v834_v50  ;;  %1394 = vrot.lane.b32.xlu1 %v1390_v12, %s1583_s26  ;;  %v2814_v0 = vld [vmem:[#allocation9_spill] sm:$0xff] }
 0x125   :  { %1392 = vrot.lane.b32.xlu0 %v1391_v11, %s1583_s26  ;;  %v882_v4 = vadd.f32 %v877_v55, %v859_v44  ;;  %v955_v11 = vmul.f32 %v2095_v2, %v2813_v24  ;;  %v954_v55 = vmul.f32 %v2101_v20, %v2813_v24  ;;  %v966_v54 = vmul.f32 %v2095_v2, %v2814_v0 }
 0x126   :  { %v867_v32 = vpop.permute.xlu1 %866  ;;  %v881_v12 = vadd.f32 %v878_v7, %v858_v53  ;;  %v965_v59 = vmul.f32 %v2101_v20, %v2814_v0 }
 0x127   :  { %v871_v60 = vadd.f32 %v867_v32, %v847_v61  ;;  %v865_v8 = vpop.permute.xlu0 %864  ;;  %v959_v38 = vrot.slane %v955_v11, 2  ;;  %v958_v44 = vrot.slane %v954_v55, 2  ;;  %v970_v51 = vrot.slane %v966_v54, 2 }
 0x128   :  { %v870_v48 = vadd.f32 %v865_v8, %v846_v43  ;;  %1431 = vrot.lane.b32.xlu1 %v1427_v3, %s1582_s23  ;;  %v969_v43 = vrot.slane %v965_v59, 2  ;;  %v1039_v54 = vmul.f32 %v2220_v5, %v2132_v58  ;;  %v2815_v59 = vld [vmem:[#allocation14_spill] sm:$0xff] }
 0x129   :  { %1429 = vrot.lane.b32.xlu0 %v1428_v16, %s1582_s23  ;;  %v893_v62 = vadd.f32 %v888_v15, %v871_v60  ;;  %v960_v9 = vsel %vm240_vm1, %v958_v44, %v959_v38 }
 0x12a   :  { %v904_v40 = vpop.permute.xlu1 %903  ;;  %v892_v47 = vadd.f32 %v889_v19, %v870_v48  ;;  %v971_v20 = vsel %vm240_vm1, %v969_v43, %v970_v51  ;;  %v2816_v43 = vld [vmem:[#allocation15_spill] sm:$0xff] }
 0x12b   :  { %v908_v23 = vadd.f32 %v904_v40, %v882_v4  ;;  %v902_v18 = vpop.permute.xlu0 %901 }
 0x12c   :  { %v907_v26 = vadd.f32 %v902_v18, %v881_v12  ;;  %1446 = vrot.lane.b32.xlu1 %v1442_v27, %s1582_s23 }
 0x12d   :  { %1444 = vrot.lane.b32.xlu0 %v1443_v1, %s1582_s23 }
 0x12e   :  { %v919_v49 = vpop.permute.xlu1 %918 }
 0x12f   :  { %v923_v31 = vadd.f32 %v919_v49, %v893_v62  ;;  %v917_v3 = vpop.permute.xlu0 %916 }
 0x130   :  { %v922_v50 = vadd.f32 %v917_v3, %v892_v47  ;;  %1461 = vrot.lane.b32.xlu1 %v1457_v56, %s1583_s26 }
 0x131   :  { %1459 = vrot.lane.b32.xlu0 %v1458_v63, %s1583_s26 }
 0x132   :  { %v934_v29 = vpop.permute.xlu1 %933 }
 0x133   :  { %v938_v25 = vadd.f32 %v934_v29, %v908_v23  ;;  %v932_v45 = vpop.permute.xlu0 %931 }
 0x134   :  { %v937_v42 = vadd.f32 %v932_v45, %v907_v26  ;;  %1476 = vrot.lane.b32.xlu1 %v1472_v57, %s1583_s26  ;;  %v1040_v45 = vmul.f32 %v2214_v52, %v2132_v58 }
 0x135   :  { %1474 = vrot.lane.b32.xlu0 %v1473_v34, %s1583_s26  ;;  %v964_v16 = vadd.f32 %v959_v38, %v938_v25 }
 0x136   :  { %v949_v33 = vpop.permute.xlu1 %948  ;;  %v963_v36 = vadd.f32 %v960_v9, %v937_v42  ;;  %v1096_v42 = vmul.f32 %v2214_v52, %v2815_v59 }
 0x137   :  { %v953_v53 = vadd.f32 %v949_v33, %v923_v31  ;;  %v947_v61 = vpop.permute.xlu0 %946  ;;  %v1095_v33 = vmul.f32 %v2220_v5, %v2815_v59 }
 0x138   :  { %v952_v32 = vadd.f32 %v947_v61, %v922_v50 }
 0x139   :  { %v975_v7 = vadd.f32 %v970_v51, %v953_v53  ;;  %v1044_v51 = vmul.f32 %v2214_v52, %v2148_v14 }
 0x13a   :  { %v986_v27 = vpop.permute.xlu1 %985  ;;  %v974_v30 = vadd.f32 %v971_v20, %v952_v32  ;;  %v1107_v32 = vmul.f32 %v2214_v52, %v2816_v43  ;;  %v1100_v20 = vrot.slane %v1096_v42, 1 }
 0x13b   :  { %v990_v2 = vadd.f32 %v986_v27, %v964_v16  ;;  %v984_v60 = vpop.permute.xlu0 %983 }
 0x13c   :  { %v989_v8 = vadd.f32 %v984_v60, %v963_v36  ;;  %v1043_v36 = vmul.f32 %v2220_v5, %v2148_v14 }
 0x13e   :  { %v1001_v15 = vpop.permute.xlu1 %1000 }
 0x13f   :  { %v1005_v48 = vadd.f32 %v1001_v15, %v975_v7  ;;  %v999_v4 = vpop.permute.xlu0 %998 }
 0x140   :  { %v1004_v56 = vadd.f32 %v999_v4, %v974_v30  ;;  %v1111_v4 = vrot.slane %v1107_v32, 1 }
 0x142   :  { %v1016_v41 = vpop.permute.xlu1 %1015 }
 0x143   :  { %v1014_v40 = vpop.permute.xlu0 %1013  ;;  %v1020_v25 = vadd.f32 %v1016_v41, %v990_v2  ;;  %v1106_v2 = vmul.f32 %v2220_v5, %v2816_v43 }
 0x144   :  { %v1019_v0 = vadd.f32 %v1014_v40, %v989_v8  ;;  %v1099_v8 = vrot.slane %v1095_v33, 1 }
 0x145   :  { %v1042_v9 = vadd.f32 %v1040_v45, %v1020_v25 }
 0x146   :  { %v1031_v12 = vpop.permute.xlu1 %1030  ;;  %v1041_v58 = vadd.f32 %v1039_v54, %v1019_v0  ;;  %v1101_v45 = vsel %vm151_vm0, %v1099_v8, %v1100_v20 }
 0x147   :  { %v1029_v1 = vpop.permute.xlu0 %1028  ;;  %v1035_v61 = vadd.f32 %v1031_v12, %v1005_v48  ;;  %v1110_v12 = vrot.slane %v1106_v2, 1 }
 0x148   :  { %v1034_v27 = vadd.f32 %v1029_v1, %v1004_v56  ;;  %v2817_v1 = vld [vmem:[#allocation17_spill] sm:$0xff] }
 0x149   :  { %v1046_v30 = vadd.f32 %v1044_v51, %v1035_v61  ;;  %v1178_v14 = vmul.f32 %v2214_v52, %v2817_v1 }
 0x14a   :  { %v1054_v10 = vpop.permute.xlu1 %1053  ;;  %v1045_v40 = vadd.f32 %v1043_v36, %v1034_v27 }
 0x14b   :  { %v1052_v37 = vpop.permute.xlu0 %1051  ;;  %v1058_v60 = vadd.f32 %v1054_v10, %v1042_v9  ;;  %v1177_v10 = vmul.f32 %v2220_v5, %v2817_v1  ;;  %v1182_v61 = vrot.slane %v1178_v14, 2 }
 0x14c   :  { %v1057_v7 = vadd.f32 %v1052_v37, %v1041_v58 }
 0x14d   :  { %v1181_v51 = vrot.slane %v1177_v10, 2 }
 0x14e   :  { %v1066_v23 = vpop.permute.xlu1 %1065 }
 0x14f   :  { %v1064_v18 = vpop.permute.xlu0 %1063  ;;  %v1070_v25 = vadd.f32 %v1066_v23, %v1046_v30  ;;  %v2818_v23 = vld [vmem:[#allocation19_spill] sm:$0xff] }
 0x150   :  { %v1069_v37 = vadd.f32 %v1064_v18, %v1045_v40  ;;  %v1189_v43 = vmul.f32 %v2214_v52, %v2818_v23  ;;  %v1188_v32 = vmul.f32 %v2220_v5, %v2818_v23 }
 0x152   :  { %v1078_v19 = vpop.permute.xlu1 %1077  ;;  %v1193_v8 = vrot.slane %v1189_v43, 2 }
 0x153   :  { %v1076_v26 = vpop.permute.xlu0 %1075  ;;  %v1082_v48 = vadd.f32 %v1078_v19, %v1058_v60 }
 0x154   :  { %v1081_v56 = vadd.f32 %v1076_v26, %v1057_v7  ;;  %v1112_v26 = vsel %vm151_vm0, %v1110_v12, %v1111_v4 }
 0x155   :  { %v1105_v19 = vadd.f32 %v1100_v20, %v1082_v48  ;;  %v1183_v20 = vsel %vm240_vm1, %v1181_v51, %v1182_v61 }
 0x156   :  { %v1090_v62 = vpop.permute.xlu1 %1089  ;;  %v1104_v33 = vadd.f32 %v1101_v45, %v1081_v56 }
 0x157   :  { %v1088_v63 = vpop.permute.xlu0 %1087  ;;  %v1094_v54 = vadd.f32 %v1090_v62, %v1070_v25  ;;  %v1319_v25 = vmul.f32 %v2408_v28, %v2333_v21 }
 0x158   :  { %v1093_v42 = vadd.f32 %v1088_v63, %v1069_v37 }
 0x159   :  { %v1116_v58 = vadd.f32 %v1111_v4, %v1094_v54 }
 0x15a   :  { %v1127_v49 = vpop.permute.xlu1 %1126  ;;  %v1115_v2 = vadd.f32 %v1112_v26, %v1093_v42  ;;  %v1266_v42 = vmul.f32 %v2415_v13, %v2343_v35 }
 0x15b   :  { %v1125_v47 = vpop.permute.xlu0 %1124  ;;  %v1131_v9 = vadd.f32 %v1127_v49, %v1105_v19  ;;  %v1192_v49 = vrot.slane %v1188_v32, 2 }
 0x15c   :  { %v1130_v18 = vadd.f32 %v1125_v47, %v1104_v33 }
 0x15e   :  { %v2572_v57 = vpop.permute.xlu1 %1141 }
 0x15f   :  { %v2574_v17 = vpop.permute.xlu0 %1139  ;;  %v1146_v63 = vadd.f32 %v2572_v57, %v1116_v58 }
 0x160   :  { %v1145_v7 = vadd.f32 %v2574_v17, %v1115_v2  ;;  %v1263_v17 = vmul.f32 %v2408_v28, %v2341_v22 }
 0x162   :  { %v1157_v24 = vpop.permute.xlu1 %1156 }
 0x163   :  { %v1155_v11 = vpop.permute.xlu0 %1154  ;;  %v1161_v62 = vadd.f32 %v1157_v24, %v1131_v9 }
 0x164   :  { %v1160_v60 = vadd.f32 %v1155_v11, %v1130_v18  ;;  %v1194_v11 = vsel %vm240_vm1, %v1192_v49, %v1193_v8 }
 0x165   :  { %v1187_v48 = vadd.f32 %v1182_v61, %v1161_v62 }
 0x166   :  { %v2576_v31 = vpop.permute.xlu1 %1171  ;;  %v1186_v4 = vadd.f32 %v1183_v20, %v1160_v60 }
 0x167   :  { %v2578_v3 = vpop.permute.xlu0 %1169  ;;  %v1176_v52 = vadd.f32 %v2576_v31, %v1146_v63 }
 0x168   :  { %v1175_v47 = vadd.f32 %v2578_v3, %v1145_v7  ;;  %v1262_v3 = vmul.f32 %v2415_v13, %v2341_v22  ;;  %v1330_v22 = vmul.f32 %v2408_v28, %v2382_v39 }
 0x169   :  { %v1198_v56 = vadd.f32 %v1193_v8, %v1176_v52  ;;  %v1411_v52 = vmul.f32 %v2415_v13, %v2428_v46 }
 0x16a   :  { %v2580_v55 = vpop.permute.xlu1 %1208  ;;  %v1197_v31 = vadd.f32 %v1194_v11, %v1175_v47  ;;  %v1334_v23 = vrot.slane %v1330_v22, 1 }
 0x16b   :  { %v2582_v50 = vpop.permute.xlu0 %1206  ;;  %v1213_v24 = vadd.f32 %v2580_v55, %v1187_v48 }
 0x16c   :  { %v1212_v57 = vadd.f32 %v2582_v50, %v1186_v4  ;;  %v1318_v50 = vmul.f32 %v2415_v13, %v2333_v21  ;;  %v1329_v21 = vmul.f32 %v2415_v13, %v2382_v39 }
 0x16e   :  { %v2584_v29 = vpop.permute.xlu1 %1223  ;;  %v1322_v33 = vrot.slane %v1318_v50, 1  ;;  %v1333_v18 = vrot.slane %v1329_v21, 1 }
 0x16f   :  { %v2586_v34 = vpop.permute.xlu0 %1221  ;;  %v1228_v55 = vadd.f32 %v2584_v29, %v1198_v56  ;;  %v1415_v56 = vrot.slane %v1411_v52, 2 }
 0x172   :  { %v2588_v38 = vpop.permute.xlu1 %1238 }
 0x173   :  { %v2592_v44 = vpop.permute.xlu0 %1236  ;;  %v1243_v12 = vadd.f32 %v2588_v38, %v1213_v24  ;;  %v1227_v38 = vadd.f32 %v2586_v34, %v1197_v31 }
 0x174   :  { %v1242_v14 = vadd.f32 %v2592_v44, %v1212_v57  ;;  %v1267_v44 = vmul.f32 %v2408_v28, %v2343_v35  ;;  %v1401_v35 = vmul.f32 %v2408_v28, %v2393_v6 }
 0x175   :  { %v1265_v37 = vadd.f32 %v1263_v17, %v1243_v12 }
 0x176   :  { %v2600_v53 = vpop.permute.xlu1 %1253  ;;  %v1264_v19 = vadd.f32 %v1262_v3, %v1242_v14  ;;  %v1405_v8 = vrot.slane %v1401_v35, 2 }
 0x177   :  { %v2606_v16 = vpop.permute.xlu0 %1251  ;;  %v1258_v10 = vadd.f32 %v2600_v53, %v1228_v55  ;;  %v1323_v53 = vrot.slane %v1319_v25, 1 }
 0x178   :  { %v1257_v29 = vadd.f32 %v2606_v16, %v1227_v38 }
 0x179   :  { %v1269_v9 = vadd.f32 %v1267_v44, %v1258_v10  ;;  %v1324_v39 = vsel %vm151_vm0, %v1322_v33, %v1323_v53 }
 0x17a   :  { %v2612_v15 = vpop.permute.xlu1 %1276  ;;  %v1268_v32 = vadd.f32 %v1266_v42, %v1257_v29 }
 0x17b   :  { %v2614_v41 = vpop.permute.xlu0 %1274  ;;  %v1281_v34 = vadd.f32 %v2612_v15, %v1265_v37  ;;  %v1400_v15 = vmul.f32 %v2415_v13, %v2393_v6 }
 0x17c   :  { %v1280_v26 = vadd.f32 %v2614_v41, %v1264_v19 }
 0x17d   :  { %v1404_v7 = vrot.slane %v1400_v15, 2 }
 0x17e   :  { %v2621_v0 = vpop.permute.xlu1 %1288 }
 0x17f   :  { %v2623_v59 = vpop.permute.xlu0 %1286  ;;  %v1293_v58 = vadd.f32 %v2621_v0, %v1269_v9  ;;  %v1412_v0 = vmul.f32 %v2408_v28, %v2428_v46  ;;  %v1406_v11 = vsel %vm240_vm1, %v1404_v7, %v1405_v8 }
 0x180   :  { %v1292_v41 = vadd.f32 %v2623_v59, %v1268_v32 }
 0x181   :  { %v1416_v57 = vrot.slane %v1412_v0, 2 }
 0x182   :  { %v1301_v27 = vpop.permute.xlu1 %1300 }
 0x183   :  { %v1299_v36 = vpop.permute.xlu0 %1298  ;;  %v1305_v51 = vadd.f32 %v1301_v27, %v1281_v34  ;;  %v1417_v46 = vsel %vm240_vm1, %v1415_v56, %v1416_v57 }
 0x184   :  { %v1304_v16 = vadd.f32 %v1299_v36, %v1280_v26  ;;  %v1335_v36 = vsel %vm151_vm0, %v1333_v18, %v1334_v23 }
 0x185   :  { %v1328_v27 = vadd.f32 %v1323_v53, %v1305_v51 }
 0x186   :  { %v1313_v30 = vpop.permute.xlu1 %1312  ;;  %v1327_v20 = vadd.f32 %v1324_v39, %v1304_v16 }
 0x187   :  { %v1311_v5 = vpop.permute.xlu0 %1310  ;;  %v1317_v2 = vadd.f32 %v1313_v30, %v1293_v58 }
 0x188   :  { %v1316_v63 = vadd.f32 %v1311_v5, %v1292_v41 }
 0x189   :  { %v1339_v59 = vadd.f32 %v1334_v23, %v1317_v2 }
 0x18a   :  { %v1350_v40 = vpop.permute.xlu1 %1349  ;;  %v1338_v4 = vadd.f32 %v1335_v36, %v1316_v63 }
 0x18b   :  { %v1348_v1 = vpop.permute.xlu0 %1347  ;;  %v1354_v49 = vadd.f32 %v1350_v40, %v1328_v27 }
 0x18c   :  { %v1353_v6 = vadd.f32 %v1348_v1, %v1327_v20 }
 0x18e   :  { %v1365_v45 = vpop.permute.xlu1 %1364 }
 0x18f   :  { %v1363_v54 = vpop.permute.xlu0 %1362  ;;  %v1369_v5 = vadd.f32 %v1365_v45, %v1339_v59 }
 0x190   :  { %v1368_v40 = vadd.f32 %v1363_v54, %v1338_v4 }
 0x192   :  { %v1380_v61 = vpop.permute.xlu1 %1379 }
 0x193   :  { %v1378_v43 = vpop.permute.xlu0 %1377  ;;  %v1384_v47 = vadd.f32 %v1380_v61, %v1354_v49 }
 0x194   :  { %v1383_v24 = vadd.f32 %v1378_v43, %v1353_v6 }
 0x195   :  { %v1410_v31 = vadd.f32 %v1405_v8, %v1384_v47 }
 0x196   :  { %v1395_v62 = vpop.permute.xlu1 %1394  ;;  %v1409_v3 = vadd.f32 %v1406_v11, %v1383_v24 }
 0x197   :  { %v1393_v60 = vpop.permute.xlu0 %1392  ;;  %v1399_v17 = vadd.f32 %v1395_v62, %v1369_v5 }
 0x198   :  { %v1398_v14 = vadd.f32 %v1393_v60, %v1368_v40 }
 0x199   :  { %v1421_v25 = vadd.f32 %v1416_v57, %v1399_v17 }
 0x19a   :  { %v1432_v48 = vpop.permute.xlu1 %1431  ;;  %v1420_v45 = vadd.f32 %v1417_v46, %v1398_v14 }
 0x19b   :  { %v1430_v30 = vpop.permute.xlu0 %1429  ;;  %v1436_v13 = vadd.f32 %v1432_v48, %v1410_v31 }
 0x19c   :  { %v1435_v1 = vadd.f32 %v1430_v30, %v1409_v3 }
 0x19e   :  { %v1447_v12 = vpop.permute.xlu1 %1446 }
 0x19f   :  { %v1445_v28 = vpop.permute.xlu0 %1444  ;;  %v1451_v37 = vadd.f32 %v1447_v12, %v1421_v25 }
 0x1a0   :  { %v1450_v44 = vadd.f32 %v1445_v28, %v1420_v45 }
 0x1a2   :  { %v1462_v55 = vpop.permute.xlu1 %1461 }
 0x1a3   :  { %v1466_v50 = vadd.f32 %v1462_v55, %v1436_v13  ;;  %v1460_v38 = vpop.permute.xlu0 %1459 }
 0x1a4   :  { %v1465_v10 = vadd.f32 %v1460_v38, %v1435_v1 }
 0x1a5   :  { %1561 = vst.msk [vmem:[%s2694_s2 + $0x28] sm:$0x3f] %vm808_vm2, %v1466_v50 }
 0x1a6   :  { %1560 = vst.msk [vmem:[%s2694_s2 + $0x20] sm:$0xff] %vm806_vm3, %v1465_v10  ;;  %v1477_v22 = vpop.permute.xlu1 %1476 }
 0x1a7   :  { %v1481_v54 = vadd.f32 %v1477_v22, %v1451_v37  ;;  %v1475_v29 = vpop.permute.xlu0 %1474 }
 0x1a8   :  { %v1480_v19 = vadd.f32 %v1475_v29, %v1450_v44 }
 0x1a9   :  { %1563 = vst.msk [vmem:[%s2694_s2 + $0x38] sm:$0x3f] %vm808_vm2, %v1481_v54 }
 0x1aa   :  { %1562 = vst.msk [vmem:[%s2694_s2 + $0x30] sm:$0xff] %vm806_vm3, %v1480_v19 }
 0x1ab   :  { %1492 = vsyncpa [#allocation3], 1 }

</bundles_post_ra>
